<compile_context>
chip_gen: v7x
topology: tpu7x:2x2x1
jax: 0.10.0
libtpu: 0.0.40
codegen_flags: <defaults>
</compile_context>

<pallas_src>
import numpy as np
import jax
import jax.numpy as jnp
from jax.experimental import pallas as pl
from jax.experimental.pallas import tpu as pltpu


# -----------------------------------------------------------------------------
# Static gather indices for the duplicated conv1 im2col.
# Row m = k*32 + p  (k = conv2 offset kh*4+kw, p = conv2 output oh*5+ow;
#                    rows p in [25,32) are padding so each k-group is 8-aligned)
# Col j = conv1 offset kh1*4+kw1.
# Input pixel: (4*oh + 2*kh + kh1, 4*ow + 2*kw + kw1)   (max index 25 < 28).
# -----------------------------------------------------------------------------
def _dup_patch_indices():
    rows = np.zeros((16, 32, 16), np.int32)
    cols = np.zeros((16, 32, 16), np.int32)
    for k in range(16):
        kh, kw = divmod(k, 4)
        for p in range(32):
            oh, ow = divmod(min(p, 24), 5)          # pad rows reuse position (4,4)
            for j in range(16):
                kh1, kw1 = divmod(j, 4)
                rows[k, p, j] = 4 * oh + 2 * kh + kh1
                cols[k, p, j] = 4 * ow + 2 * kw + kw1
    return rows.reshape(512, 16), cols.reshape(512, 16)


_DUP_ROWS, _DUP_COLS = _dup_patch_indices()


def _cnn_kernel(dp_ref, w1_ref, b1_ref, w2_ref, b2_ref,
                wl1_ref, bl1_ref, wl2_ref, bl2_ref, o_ref):
    """Full forward pass for one image; everything stays in VMEM/vregs."""
    # conv1 + ReLU: (512,16) @ (16,32) on the MXU (duplicated-patch form).
    h1 = jnp.dot(dp_ref[...], w1_ref[...], preferred_element_type=jnp.float32)
    h1 = jnp.maximum(h1 + b1_ref[...], 0.0).astype(jnp.bfloat16)        # (512,32)

    # conv2 + ReLU: 16 static 8-aligned row slices of h1 -> small matmuls.
    acc2 = jnp.zeros((25, 32), jnp.float32)
    for k in range(16):
        acc2 = acc2 + jnp.dot(h1[k * 32:k * 32 + 25, :], w2_ref[k],
                              preferred_element_type=jnp.float32)
    h2 = jnp.maximum(acc2 + b2_ref[...], 0.0)                           # (25,32) f32

    # fc1 + ReLU: torch flatten permutation folded into wl1 prep; decomposed
    # over the 25 spatial positions (avoids any sublane->lane reshape).
    acc3 = jnp.zeros((1, 128), jnp.float32)
    for p in range(25):
        acc3 = acc3 + jnp.dot(h2[p:p + 1, :].astype(jnp.bfloat16), wl1_ref[p],
                              preferred_element_type=jnp.float32)
    f1 = jnp.maximum(acc3 + bl1_ref[...], 0.0).astype(jnp.bfloat16)     # (1,128)

    # fc2: output padded to 128 lanes -> unmasked, lane-dense store.
    out = jnp.dot(f1, wl2_ref[...], preferred_element_type=jnp.float32)
    o_ref[...] = out + bl2_ref[...]


def prepare_params(params):
    """One-time weight repacking: transposes, flatten permutation, lane padding."""
    w1 = params["w1"].reshape(32, 16).T                                   # (16,32)  [kh1*4+kw1, oc]
    w2 = jnp.transpose(params["w2"], (2, 3, 1, 0)).reshape(16, 32, 32)    # (16,32,32) [k, ic, oc]
    # wl1[n, c*25 + p]  ->  wl1_slabs[p, c, n]
    wl1 = jnp.transpose(params["wl1"].reshape(128, 32, 25), (2, 1, 0))    # (25,32,128)
    wl2 = jnp.zeros((128, 128), jnp.float32).at[:, :10].set(params["wl2"].T)
    bl2 = jnp.zeros((1, 128), jnp.float32).at[0, :10].set(params["bl2"])
    return {
        "w1": w1.astype(jnp.bfloat16),
        "b1": params["b1"].reshape(1, 32).astype(jnp.float32),
        "w2": w2.astype(jnp.bfloat16),
        "b2": params["b2"].reshape(1, 32).astype(jnp.float32),
        "wl1": wl1.astype(jnp.bfloat16),
        "bl1": params["bl1"].reshape(1, 128).astype(jnp.float32),
        "wl2": wl2.astype(jnp.bfloat16),
        "bl2": bl2,
    }


def cnn_forward(prepped, x):
    """x: (N,1,28,28) f32 NCHW -> logits (N,10) f32."""
    n = x.shape[0]
    # Tiny wrapper-side gather of duplicated conv1 patches (~16 KB per image).
    dp = x[:, 0, :, :][:, _DUP_ROWS, _DUP_COLS].astype(jnp.bfloat16)      # (N,512,16)

    out = pl.pallas_call(
        _cnn_kernel,
        out_shape=jax.ShapeDtypeStruct((n, 1, 128), jnp.float32),
        grid=(n,),
        in_specs=[
            pl.BlockSpec((None, 512, 16), lambda i: (i, 0, 0)),   # patches (per image)
            pl.BlockSpec((16, 32), lambda i: (0, 0)),             # w1
            pl.BlockSpec((1, 32), lambda i: (0, 0)),              # b1
            pl.BlockSpec((16, 32, 32), lambda i: (0, 0, 0)),      # w2
            pl.BlockSpec((1, 32), lambda i: (0, 0)),              # b2
            pl.BlockSpec((25, 32, 128), lambda i: (0, 0, 0)),     # wl1
            pl.BlockSpec((1, 128), lambda i: (0, 0)),             # bl1
            pl.BlockSpec((128, 128), lambda i: (0, 0)),           # wl2 (padded)
            pl.BlockSpec((1, 128), lambda i: (0, 0)),             # bl2 (padded)
        ],
        out_specs=pl.BlockSpec((None, 1, 128), lambda i: (i, 0, 0)),
        compiler_params=pltpu.CompilerParams(
            dimension_semantics=("parallel",)),
    )(dp, prepped["w1"], prepped["b1"], prepped["w2"], prepped["b2"],
      prepped["wl1"], prepped["bl1"], prepped["wl2"], prepped["bl2"])

    return out.reshape(n, 128)[:, :10]


def init_params(key):
    """Deterministic init mirroring PyTorch default U(-1/sqrt(fan_in), +...)."""
    ks = jax.random.split(key, 8)

    def u(k, shape, fan_in):
        bound = 1.0 / jnp.sqrt(fan_in)
        return jax.random.uniform(k, shape, jnp.float32, -bound, bound)

    return {
        "w1": u(ks[0], (32, 1, 4, 4), 1 * 4 * 4),
        "b1": u(ks[1], (32,), 1 * 4 * 4),
        "w2": u(ks[2], (32, 32, 4, 4), 32 * 4 * 4),
        "b2": u(ks[3], (32,), 32 * 4 * 4),
        "wl1": u(ks[4], (128, 800), 800),   # PyTorch Linear: (out, in)
        "bl1": u(ks[5], (128,), 800),
        "wl2": u(ks[6], (10, 128), 128),
        "bl2": u(ks[7], (10,), 128),
    }


def cnn_reference(params, x):
    """Pure-JAX reference (lax.conv) for a correctness sanity check."""
    def conv(x, w, b):
        y = jax.lax.conv_general_dilated(
            x, w, window_strides=(2, 2), padding="VALID",
            dimension_numbers=("NCHW", "OIHW", "NCHW"))
        return jnp.maximum(y + b[None, :, None, None], 0.0)

    x = conv(x, params["w1"], params["b1"])
    x = conv(x, params["w2"], params["b2"])
    x = x.reshape(x.shape[0], -1)
    x = jnp.maximum(x @ params["wl1"].T + params["bl1"], 0.0)
    return x @ params["wl2"].T + params["bl2"]


if __name__ == "__main__":
    key = jax.random.PRNGKey(0)
    pkey, xkey = jax.random.split(key)
    params = init_params(pkey)
    prepped = prepare_params(params)

    # Linear(800,...) implies 1x28x28 inputs (28 -> 13 -> 5, 32*5*5 = 800).
    x = jax.random.normal(xkey, (2, 1, 28, 28), jnp.float32)

    out = jax.block_until_ready(jax.jit(cnn_forward)(prepped, x))
    assert out.shape == (2, 10) and out.dtype == jnp.float32

    ref = jax.block_until_ready(cnn_reference(params, x))
    # bf16 MXU operands with f32 accumulation -> relaxed tolerance vs f32 ref.
    err = float(jnp.max(jnp.abs(out - ref)))
    assert jnp.allclose(out, ref, atol=5e-2, rtol=5e-2), f"max abs err {err}"

    print("KERNEL_OK")
</pallas_src>

<mosaic_0001>
module attributes {stable_mosaic.version = 11 : i64} {
  func.func @_cnn_kernel(%arg0: i32, %arg1: memref<1x512x16xbf16, #tpu.memory_space<vmem>>, %arg2: memref<16x32xbf16, #tpu.memory_space<vmem>>, %arg3: memref<1x32xf32, #tpu.memory_space<vmem>>, %arg4: memref<16x32x32xbf16, #tpu.memory_space<vmem>>, %arg5: memref<1x32xf32, #tpu.memory_space<vmem>>, %arg6: memref<25x32x128xbf16, #tpu.memory_space<vmem>>, %arg7: memref<1x128xf32, #tpu.memory_space<vmem>>, %arg8: memref<128x128xbf16, #tpu.memory_space<vmem>>, %arg9: memref<1x128xf32, #tpu.memory_space<vmem>>, %arg10: memref<1x1x128xf32, #tpu.memory_space<vmem>>) attributes {dimension_semantics = [#tpu.dimension_semantics<parallel>], iteration_bounds = array<i64: 2>, scalar_prefetch = 0 : i64, scratch_operands = 0 : i64, tpu.core_type = #tpu.core_type<tc>, window_params = [{transform_indices = @transform_0, window_bounds = array<i64: 1, 512, 16>}, {pipeline_mode = #tpu.pipeline_mode<synchronous>, transform_indices = @transform_1, window_bounds = array<i64: 16, 32>}, {pipeline_mode = #tpu.pipeline_mode<synchronous>, transform_indices = @transform_2, window_bounds = array<i64: 1, 32>}, {pipeline_mode = #tpu.pipeline_mode<synchronous>, transform_indices = @transform_3, window_bounds = array<i64: 16, 32, 32>}, {pipeline_mode = #tpu.pipeline_mode<synchronous>, transform_indices = @transform_4, window_bounds = array<i64: 1, 32>}, {pipeline_mode = #tpu.pipeline_mode<synchronous>, transform_indices = @transform_5, window_bounds = array<i64: 25, 32, 128>}, {pipeline_mode = #tpu.pipeline_mode<synchronous>, transform_indices = @transform_6, window_bounds = array<i64: 1, 128>}, {pipeline_mode = #tpu.pipeline_mode<synchronous>, transform_indices = @transform_7, window_bounds = array<i64: 128, 128>}, {pipeline_mode = #tpu.pipeline_mode<synchronous>, transform_indices = @transform_8, window_bounds = array<i64: 1, 128>}, {transform_indices = @transform_9, window_bounds = array<i64: 1, 1, 128>}]} {
    %c0 = arith.constant 0 : index
    %c0_0 = arith.constant 0 : index
    %c0_1 = arith.constant 0 : index
    %0 = vector.load %arg1[%c0, %c0_0, %c0_1] : memref<1x512x16xbf16, #tpu.memory_space<vmem>>, vector<1x512x16xbf16>
    %1 = vector.shape_cast %0 : vector<1x512x16xbf16> to vector<512x16xbf16>
    %c0_2 = arith.constant 0 : index
    %c0_3 = arith.constant 0 : index
    %2 = vector.load %arg2[%c0_2, %c0_3] : memref<16x32xbf16, #tpu.memory_space<vmem>>, vector<16x32xbf16>
    %cst = arith.constant dense<0.000000e+00> : vector<512x32xf32>
    %3 = tpu.matmul %1, %2, %cst {dimension_numbers = #tpu.dot_dimension_numbers<[1], [0], [0], [1], [0, 0, 1, 1], [], []>} : vector<512x16xbf16>, vector<16x32xbf16>, vector<512x32xf32> -> vector<512x32xf32>
    %c0_4 = arith.constant 0 : index
    %c0_5 = arith.constant 0 : index
    %4 = vector.load %arg3[%c0_4, %c0_5] : memref<1x32xf32, #tpu.memory_space<vmem>>, vector<1x32xf32>
    %5 = vector.broadcast %4 : vector<1x32xf32> to vector<512x32xf32>
    %6 = arith.addf %3, %5 : vector<512x32xf32>
    %cst_6 = arith.constant 0.000000e+00 : f32
    %7 = vector.broadcast %cst_6 : f32 to vector<512x32xf32>
    %8 = arith.maximumf %6, %7 : vector<512x32xf32>
    %9 = arith.truncf %8 : vector<512x32xf32> to vector<512x32xbf16>
    %cst_7 = arith.constant 0.000000e+00 : f32
    %10 = vector.broadcast %cst_7 : f32 to vector<25x32xf32>
    %11 = vector.extract_strided_slice %9 {offsets = [0, 0], sizes = [25, 32], strides = [1, 1]} : vector<512x32xbf16> to vector<25x32xbf16>
    %c0_8 = arith.constant 0 : index
    %c0_9 = arith.constant 0 : index
    %c0_10 = arith.constant 0 : index
    %12 = vector.load %arg4[%c0_8, %c0_9, %c0_10] : memref<16x32x32xbf16, #tpu.memory_space<vmem>>, vector<1x32x32xbf16>
    %13 = vector.shape_cast %12 : vector<1x32x32xbf16> to vector<32x32xbf16>
    %cst_11 = arith.constant dense<0.000000e+00> : vector<25x32xf32>
    %14 = tpu.matmul %11, %13, %cst_11 {dimension_numbers = #tpu.dot_dimension_numbers<[1], [0], [0], [1], [0, 0, 1, 1], [], []>} : vector<25x32xbf16>, vector<32x32xbf16>, vector<25x32xf32> -> vector<25x32xf32>
    %15 = arith.addf %10, %14 : vector<25x32xf32>
    %16 = vector.extract_strided_slice %9 {offsets = [32, 0], sizes = [25, 32], strides = [1, 1]} : vector<512x32xbf16> to vector<25x32xbf16>
    %c1 = arith.constant 1 : index
    %c0_12 = arith.constant 0 : index
    %c0_13 = arith.constant 0 : index
    %17 = vector.load %arg4[%c1, %c0_12, %c0_13] : memref<16x32x32xbf16, #tpu.memory_space<vmem>>, vector<1x32x32xbf16>
    %18 = vector.shape_cast %17 : vector<1x32x32xbf16> to vector<32x32xbf16>
    %cst_14 = arith.constant dense<0.000000e+00> : vector<25x32xf32>
    %19 = tpu.matmul %16, %18, %cst_14 {dimension_numbers = #tpu.dot_dimension_numbers<[1], [0], [0], [1], [0, 0, 1, 1], [], []>} : vector<25x32xbf16>, vector<32x32xbf16>, vector<25x32xf32> -> vector<25x32xf32>
    %20 = arith.addf %15, %19 : vector<25x32xf32>
    %21 = vector.extract_strided_slice %9 {offsets = [64, 0], sizes = [25, 32], strides = [1, 1]} : vector<512x32xbf16> to vector<25x32xbf16>
    %c2 = arith.constant 2 : index
    %c0_15 = arith.constant 0 : index
    %c0_16 = arith.constant 0 : index
    %22 = vector.load %arg4[%c2, %c0_15, %c0_16] : memref<16x32x32xbf16, #tpu.memory_space<vmem>>, vector<1x32x32xbf16>
    %23 = vector.shape_cast %22 : vector<1x32x32xbf16> to vector<32x32xbf16>
    %cst_17 = arith.constant dense<0.000000e+00> : vector<25x32xf32>
    %24 = tpu.matmul %21, %23, %cst_17 {dimension_numbers = #tpu.dot_dimension_numbers<[1], [0], [0], [1], [0, 0, 1, 1], [], []>} : vector<25x32xbf16>, vector<32x32xbf16>, vector<25x32xf32> -> vector<25x32xf32>
    %25 = arith.addf %20, %24 : vector<25x32xf32>
    %26 = vector.extract_strided_slice %9 {offsets = [96, 0], sizes = [25, 32], strides = [1, 1]} : vector<512x32xbf16> to vector<25x32xbf16>
    %c3 = arith.constant 3 : index
    %c0_18 = arith.constant 0 : index
    %c0_19 = arith.constant 0 : index
    %27 = vector.load %arg4[%c3, %c0_18, %c0_19] : memref<16x32x32xbf16, #tpu.memory_space<vmem>>, vector<1x32x32xbf16>
    %28 = vector.shape_cast %27 : vector<1x32x32xbf16> to vector<32x32xbf16>
    %cst_20 = arith.constant dense<0.000000e+00> : vector<25x32xf32>
    %29 = tpu.matmul %26, %28, %cst_20 {dimension_numbers = #tpu.dot_dimension_numbers<[1], [0], [0], [1], [0, 0, 1, 1], [], []>} : vector<25x32xbf16>, vector<32x32xbf16>, vector<25x32xf32> -> vector<25x32xf32>
    %30 = arith.addf %25, %29 : vector<25x32xf32>
    %31 = vector.extract_strided_slice %9 {offsets = [128, 0], sizes = [25, 32], strides = [1, 1]} : vector<512x32xbf16> to vector<25x32xbf16>
    %c4 = arith.constant 4 : index
    %c0_21 = arith.constant 0 : index
    %c0_22 = arith.constant 0 : index
    %32 = vector.load %arg4[%c4, %c0_21, %c0_22] : memref<16x32x32xbf16, #tpu.memory_space<vmem>>, vector<1x32x32xbf16>
    %33 = vector.shape_cast %32 : vector<1x32x32xbf16> to vector<32x32xbf16>
    %cst_23 = arith.constant dense<0.000000e+00> : vector<25x32xf32>
    %34 = tpu.matmul %31, %33, %cst_23 {dimension_numbers = #tpu.dot_dimension_numbers<[1], [0], [0], [1], [0, 0, 1, 1], [], []>} : vector<25x32xbf16>, vector<32x32xbf16>, vector<25x32xf32> -> vector<25x32xf32>
    %35 = arith.addf %30, %34 : vector<25x32xf32>
    %36 = vector.extract_strided_slice %9 {offsets = [160, 0], sizes = [25, 32], strides = [1, 1]} : vector<512x32xbf16> to vector<25x32xbf16>
    %c5 = arith.constant 5 : index
    %c0_24 = arith.constant 0 : index
    %c0_25 = arith.constant 0 : index
    %37 = vector.load %arg4[%c5, %c0_24, %c0_25] : memref<16x32x32xbf16, #tpu.memory_space<vmem>>, vector<1x32x32xbf16>
    %38 = vector.shape_cast %37 : vector<1x32x32xbf16> to vector<32x32xbf16>
    %cst_26 = arith.constant dense<0.000000e+00> : vector<25x32xf32>
    %39 = tpu.matmul %36, %38, %cst_26 {dimension_numbers = #tpu.dot_dimension_numbers<[1], [0], [0], [1], [0, 0, 1, 1], [], []>} : vector<25x32xbf16>, vector<32x32xbf16>, vector<25x32xf32> -> vector<25x32xf32>
    %40 = arith.addf %35, %39 : vector<25x32xf32>
    %41 = vector.extract_strided_slice %9 {offsets = [192, 0], sizes = [25, 32], strides = [1, 1]} : vector<512x32xbf16> to vector<25x32xbf16>
    %c6 = arith.constant 6 : index
    %c0_27 = arith.constant 0 : index
    %c0_28 = arith.constant 0 : index
    %42 = vector.load %arg4[%c6, %c0_27, %c0_28] : memref<16x32x32xbf16, #tpu.memory_space<vmem>>, vector<1x32x32xbf16>
    %43 = vector.shape_cast %42 : vector<1x32x32xbf16> to vector<32x32xbf16>
    %cst_29 = arith.constant dense<0.000000e+00> : vector<25x32xf32>
    %44 = tpu.matmul %41, %43, %cst_29 {dimension_numbers = #tpu.dot_dimension_numbers<[1], [0], [0], [1], [0, 0, 1, 1], [], []>} : vector<25x32xbf16>, vector<32x32xbf16>, vector<25x32xf32> -> vector<25x32xf32>
    %45 = arith.addf %40, %44 : vector<25x32xf32>
    %46 = vector.extract_strided_slice %9 {offsets = [224, 0], sizes = [25, 32], strides = [1, 1]} : vector<512x32xbf16> to vector<25x32xbf16>
    %c7 = arith.constant 7 : index
    %c0_30 = arith.constant 0 : index
    %c0_31 = arith.constant 0 : index
    %47 = vector.load %arg4[%c7, %c0_30, %c0_31] : memref<16x32x32xbf16, #tpu.memory_space<vmem>>, vector<1x32x32xbf16>
    %48 = vector.shape_cast %47 : vector<1x32x32xbf16> to vector<32x32xbf16>
    %cst_32 = arith.constant dense<0.000000e+00> : vector<25x32xf32>
    %49 = tpu.matmul %46, %48, %cst_32 {dimension_numbers = #tpu.dot_dimension_numbers<[1], [0], [0], [1], [0, 0, 1, 1], [], []>} : vector<25x32xbf16>, vector<32x32xbf16>, vector<25x32xf32> -> vector<25x32xf32>
    %50 = arith.addf %45, %49 : vector<25x32xf32>
    %51 = vector.extract_strided_slice %9 {offsets = [256, 0], sizes = [25, 32], strides = [1, 1]} : vector<512x32xbf16> to vector<25x32xbf16>
    %c8 = arith.constant 8 : index
    %c0_33 = arith.constant 0 : index
    %c0_34 = arith.constant 0 : index
    %52 = vector.load %arg4[%c8, %c0_33, %c0_34] : memref<16x32x32xbf16, #tpu.memory_space<vmem>>, vector<1x32x32xbf16>
    %53 = vector.shape_cast %52 : vector<1x32x32xbf16> to vector<32x32xbf16>
    %cst_35 = arith.constant dense<0.000000e+00> : vector<25x32xf32>
    %54 = tpu.matmul %51, %53, %cst_35 {dimension_numbers = #tpu.dot_dimension_numbers<[1], [0], [0], [1], [0, 0, 1, 1], [], []>} : vector<25x32xbf16>, vector<32x32xbf16>, vector<25x32xf32> -> vector<25x32xf32>
    %55 = arith.addf %50, %54 : vector<25x32xf32>
    %56 = vector.extract_strided_slice %9 {offsets = [288, 0], sizes = [25, 32], strides = [1, 1]} : vector<512x32xbf16> to vector<25x32xbf16>
    %c9 = arith.constant 9 : index
    %c0_36 = arith.constant 0 : index
    %c0_37 = arith.constant 0 : index
    %57 = vector.load %arg4[%c9, %c0_36, %c0_37] : memref<16x32x32xbf16, #tpu.memory_space<vmem>>, vector<1x32x32xbf16>
    %58 = vector.shape_cast %57 : vector<1x32x32xbf16> to vector<32x32xbf16>
    %cst_38 = arith.constant dense<0.000000e+00> : vector<25x32xf32>
    %59 = tpu.matmul %56, %58, %cst_38 {dimension_numbers = #tpu.dot_dimension_numbers<[1], [0], [0], [1], [0, 0, 1, 1], [], []>} : vector<25x32xbf16>, vector<32x32xbf16>, vector<25x32xf32> -> vector<25x32xf32>
    %60 = arith.addf %55, %59 : vector<25x32xf32>
    %61 = vector.extract_strided_slice %9 {offsets = [320, 0], sizes = [25, 32], strides = [1, 1]} : vector<512x32xbf16> to vector<25x32xbf16>
    %c10 = arith.constant 10 : index
    %c0_39 = arith.constant 0 : index
    %c0_40 = arith.constant 0 : index
    %62 = vector.load %arg4[%c10, %c0_39, %c0_40] : memref<16x32x32xbf16, #tpu.memory_space<vmem>>, vector<1x32x32xbf16>
    %63 = vector.shape_cast %62 : vector<1x32x32xbf16> to vector<32x32xbf16>
    %cst_41 = arith.constant dense<0.000000e+00> : vector<25x32xf32>
    %64 = tpu.matmul %61, %63, %cst_41 {dimension_numbers = #tpu.dot_dimension_numbers<[1], [0], [0], [1], [0, 0, 1, 1], [], []>} : vector<25x32xbf16>, vector<32x32xbf16>, vector<25x32xf32> -> vector<25x32xf32>
    %65 = arith.addf %60, %64 : vector<25x32xf32>
    %66 = vector.extract_strided_slice %9 {offsets = [352, 0], sizes = [25, 32], strides = [1, 1]} : vector<512x32xbf16> to vector<25x32xbf16>
    %c11 = arith.constant 11 : index
    %c0_42 = arith.constant 0 : index
    %c0_43 = arith.constant 0 : index
    %67 = vector.load %arg4[%c11, %c0_42, %c0_43] : memref<16x32x32xbf16, #tpu.memory_space<vmem>>, vector<1x32x32xbf16>
    %68 = vector.shape_cast %67 : vector<1x32x32xbf16> to vector<32x32xbf16>
    %cst_44 = arith.constant dense<0.000000e+00> : vector<25x32xf32>
    %69 = tpu.matmul %66, %68, %cst_44 {dimension_numbers = #tpu.dot_dimension_numbers<[1], [0], [0], [1], [0, 0, 1, 1], [], []>} : vector<25x32xbf16>, vector<32x32xbf16>, vector<25x32xf32> -> vector<25x32xf32>
    %70 = arith.addf %65, %69 : vector<25x32xf32>
    %71 = vector.extract_strided_slice %9 {offsets = [384, 0], sizes = [25, 32], strides = [1, 1]} : vector<512x32xbf16> to vector<25x32xbf16>
    %c12 = arith.constant 12 : index
    %c0_45 = arith.constant 0 : index
    %c0_46 = arith.constant 0 : index
    %72 = vector.load %arg4[%c12, %c0_45, %c0_46] : memref<16x32x32xbf16, #tpu.memory_space<vmem>>, vector<1x32x32xbf16>
    %73 = vector.shape_cast %72 : vector<1x32x32xbf16> to vector<32x32xbf16>
    %cst_47 = arith.constant dense<0.000000e+00> : vector<25x32xf32>
    %74 = tpu.matmul %71, %73, %cst_47 {dimension_numbers = #tpu.dot_dimension_numbers<[1], [0], [0], [1], [0, 0, 1, 1], [], []>} : vector<25x32xbf16>, vector<32x32xbf16>, vector<25x32xf32> -> vector<25x32xf32>
    %75 = arith.addf %70, %74 : vector<25x32xf32>
    %76 = vector.extract_strided_slice %9 {offsets = [416, 0], sizes = [25, 32], strides = [1, 1]} : vector<512x32xbf16> to vector<25x32xbf16>
    %c13 = arith.constant 13 : index
    %c0_48 = arith.constant 0 : index
    %c0_49 = arith.constant 0 : index
    %77 = vector.load %arg4[%c13, %c0_48, %c0_49] : memref<16x32x32xbf16, #tpu.memory_space<vmem>>, vector<1x32x32xbf16>
    %78 = vector.shape_cast %77 : vector<1x32x32xbf16> to vector<32x32xbf16>
    %cst_50 = arith.constant dense<0.000000e+00> : vector<25x32xf32>
    %79 = tpu.matmul %76, %78, %cst_50 {dimension_numbers = #tpu.dot_dimension_numbers<[1], [0], [0], [1], [0, 0, 1, 1], [], []>} : vector<25x32xbf16>, vector<32x32xbf16>, vector<25x32xf32> -> vector<25x32xf32>
    %80 = arith.addf %75, %79 : vector<25x32xf32>
    %81 = vector.extract_strided_slice %9 {offsets = [448, 0], sizes = [25, 32], strides = [1, 1]} : vector<512x32xbf16> to vector<25x32xbf16>
    %c14 = arith.constant 14 : index
    %c0_51 = arith.constant 0 : index
    %c0_52 = arith.constant 0 : index
    %82 = vector.load %arg4[%c14, %c0_51, %c0_52] : memref<16x32x32xbf16, #tpu.memory_space<vmem>>, vector<1x32x32xbf16>
    %83 = vector.shape_cast %82 : vector<1x32x32xbf16> to vector<32x32xbf16>
    %cst_53 = arith.constant dense<0.000000e+00> : vector<25x32xf32>
    %84 = tpu.matmul %81, %83, %cst_53 {dimension_numbers = #tpu.dot_dimension_numbers<[1], [0], [0], [1], [0, 0, 1, 1], [], []>} : vector<25x32xbf16>, vector<32x32xbf16>, vector<25x32xf32> -> vector<25x32xf32>
    %85 = arith.addf %80, %84 : vector<25x32xf32>
    %86 = vector.extract_strided_slice %9 {offsets = [480, 0], sizes = [25, 32], strides = [1, 1]} : vector<512x32xbf16> to vector<25x32xbf16>
    %c15 = arith.constant 15 : index
    %c0_54 = arith.constant 0 : index
    %c0_55 = arith.constant 0 : index
    %87 = vector.load %arg4[%c15, %c0_54, %c0_55] : memref<16x32x32xbf16, #tpu.memory_space<vmem>>, vector<1x32x32xbf16>
    %88 = vector.shape_cast %87 : vector<1x32x32xbf16> to vector<32x32xbf16>
    %cst_56 = arith.constant dense<0.000000e+00> : vector<25x32xf32>
    %89 = tpu.matmul %86, %88, %cst_56 {dimension_numbers = #tpu.dot_dimension_numbers<[1], [0], [0], [1], [0, 0, 1, 1], [], []>} : vector<25x32xbf16>, vector<32x32xbf16>, vector<25x32xf32> -> vector<25x32xf32>
    %90 = arith.addf %85, %89 : vector<25x32xf32>
    %c0_57 = arith.constant 0 : index
    %c0_58 = arith.constant 0 : index
    %91 = vector.load %arg5[%c0_57, %c0_58] : memref<1x32xf32, #tpu.memory_space<vmem>>, vector<1x32xf32>
    %92 = vector.broadcast %91 : vector<1x32xf32> to vector<25x32xf32>
    %93 = arith.addf %90, %92 : vector<25x32xf32>
    %cst_59 = arith.constant 0.000000e+00 : f32
    %94 = vector.broadcast %cst_59 : f32 to vector<25x32xf32>
    %95 = arith.maximumf %93, %94 : vector<25x32xf32>
    %cst_60 = arith.constant 0.000000e+00 : f32
    %96 = vector.broadcast %cst_60 : f32 to vector<1x128xf32>
    %97 = vector.extract_strided_slice %95 {offsets = [0, 0], sizes = [1, 32], strides = [1, 1]} : vector<25x32xf32> to vector<1x32xf32>
    %98 = arith.truncf %97 : vector<1x32xf32> to vector<1x32xbf16>
    %c0_61 = arith.constant 0 : index
    %c0_62 = arith.constant 0 : index
    %c0_63 = arith.constant 0 : index
    %99 = vector.load %arg6[%c0_61, %c0_62, %c0_63] : memref<25x32x128xbf16, #tpu.memory_space<vmem>>, vector<1x32x128xbf16>
    %100 = vector.shape_cast %99 : vector<1x32x128xbf16> to vector<32x128xbf16>
    %cst_64 = arith.constant dense<0.000000e+00> : vector<1x128xf32>
    %101 = tpu.matmul %98, %100, %cst_64 {dimension_numbers = #tpu.dot_dimension_numbers<[1], [0], [0], [1], [0, 0, 1, 1], [], []>} : vector<1x32xbf16>, vector<32x128xbf16>, vector<1x128xf32> -> vector<1x128xf32>
    %102 = arith.addf %96, %101 : vector<1x128xf32>
    %103 = vector.extract_strided_slice %95 {offsets = [1, 0], sizes = [1, 32], strides = [1, 1]} : vector<25x32xf32> to vector<1x32xf32>
    %104 = arith.truncf %103 : vector<1x32xf32> to vector<1x32xbf16>
    %c1_65 = arith.constant 1 : index
    %c0_66 = arith.constant 0 : index
    %c0_67 = arith.constant 0 : index
    %105 = vector.load %arg6[%c1_65, %c0_66, %c0_67] : memref<25x32x128xbf16, #tpu.memory_space<vmem>>, vector<1x32x128xbf16>
    %106 = vector.shape_cast %105 : vector<1x32x128xbf16> to vector<32x128xbf16>
    %cst_68 = arith.constant dense<0.000000e+00> : vector<1x128xf32>
    %107 = tpu.matmul %104, %106, %cst_68 {dimension_numbers = #tpu.dot_dimension_numbers<[1], [0], [0], [1], [0, 0, 1, 1], [], []>} : vector<1x32xbf16>, vector<32x128xbf16>, vector<1x128xf32> -> vector<1x128xf32>
    %108 = arith.addf %102, %107 : vector<1x128xf32>
    %109 = vector.extract_strided_slice %95 {offsets = [2, 0], sizes = [1, 32], strides = [1, 1]} : vector<25x32xf32> to vector<1x32xf32>
    %110 = arith.truncf %109 : vector<1x32xf32> to vector<1x32xbf16>
    %c2_69 = arith.constant 2 : index
    %c0_70 = arith.constant 0 : index
    %c0_71 = arith.constant 0 : index
    %111 = vector.load %arg6[%c2_69, %c0_70, %c0_71] : memref<25x32x128xbf16, #tpu.memory_space<vmem>>, vector<1x32x128xbf16>
    %112 = vector.shape_cast %111 : vector<1x32x128xbf16> to vector<32x128xbf16>
    %cst_72 = arith.constant dense<0.000000e+00> : vector<1x128xf32>
    %113 = tpu.matmul %110, %112, %cst_72 {dimension_numbers = #tpu.dot_dimension_numbers<[1], [0], [0], [1], [0, 0, 1, 1], [], []>} : vector<1x32xbf16>, vector<32x128xbf16>, vector<1x128xf32> -> vector<1x128xf32>
    %114 = arith.addf %108, %113 : vector<1x128xf32>
    %115 = vector.extract_strided_slice %95 {offsets = [3, 0], sizes = [1, 32], strides = [1, 1]} : vector<25x32xf32> to vector<1x32xf32>
    %116 = arith.truncf %115 : vector<1x32xf32> to vector<1x32xbf16>
    %c3_73 = arith.constant 3 : index
    %c0_74 = arith.constant 0 : index
    %c0_75 = arith.constant 0 : index
    %117 = vector.load %arg6[%c3_73, %c0_74, %c0_75] : memref<25x32x128xbf16, #tpu.memory_space<vmem>>, vector<1x32x128xbf16>
    %118 = vector.shape_cast %117 : vector<1x32x128xbf16> to vector<32x128xbf16>
    %cst_76 = arith.constant dense<0.000000e+00> : vector<1x128xf32>
    %119 = tpu.matmul %116, %118, %cst_76 {dimension_numbers = #tpu.dot_dimension_numbers<[1], [0], [0], [1], [0, 0, 1, 1], [], []>} : vector<1x32xbf16>, vector<32x128xbf16>, vector<1x128xf32> -> vector<1x128xf32>
    %120 = arith.addf %114, %119 : vector<1x128xf32>
    %121 = vector.extract_strided_slice %95 {offsets = [4, 0], sizes = [1, 32], strides = [1, 1]} : vector<25x32xf32> to vector<1x32xf32>
    %122 = arith.truncf %121 : vector<1x32xf32> to vector<1x32xbf16>
    %c4_77 = arith.constant 4 : index
    %c0_78 = arith.constant 0 : index
    %c0_79 = arith.constant 0 : index
    %123 = vector.load %arg6[%c4_77, %c0_78, %c0_79] : memref<25x32x128xbf16, #tpu.memory_space<vmem>>, vector<1x32x128xbf16>
    %124 = vector.shape_cast %123 : vector<1x32x128xbf16> to vector<32x128xbf16>
    %cst_80 = arith.constant dense<0.000000e+00> : vector<1x128xf32>
    %125 = tpu.matmul %122, %124, %cst_80 {dimension_numbers = #tpu.dot_dimension_numbers<[1], [0], [0], [1], [0, 0, 1, 1], [], []>} : vector<1x32xbf16>, vector<32x128xbf16>, vector<1x128xf32> -> vector<1x128xf32>
    %126 = arith.addf %120, %125 : vector<1x128xf32>
    %127 = vector.extract_strided_slice %95 {offsets = [5, 0], sizes = [1, 32], strides = [1, 1]} : vector<25x32xf32> to vector<1x32xf32>
    %128 = arith.truncf %127 : vector<1x32xf32> to vector<1x32xbf16>
    %c5_81 = arith.constant 5 : index
    %c0_82 = arith.constant 0 : index
    %c0_83 = arith.constant 0 : index
    %129 = vector.load %arg6[%c5_81, %c0_82, %c0_83] : memref<25x32x128xbf16, #tpu.memory_space<vmem>>, vector<1x32x128xbf16>
    %130 = vector.shape_cast %129 : vector<1x32x128xbf16> to vector<32x128xbf16>
    %cst_84 = arith.constant dense<0.000000e+00> : vector<1x128xf32>
    %131 = tpu.matmul %128, %130, %cst_84 {dimension_numbers = #tpu.dot_dimension_numbers<[1], [0], [0], [1], [0, 0, 1, 1], [], []>} : vector<1x32xbf16>, vector<32x128xbf16>, vector<1x128xf32> -> vector<1x128xf32>
    %132 = arith.addf %126, %131 : vector<1x128xf32>
    %133 = vector.extract_strided_slice %95 {offsets = [6, 0], sizes = [1, 32], strides = [1, 1]} : vector<25x32xf32> to vector<1x32xf32>
    %134 = arith.truncf %133 : vector<1x32xf32> to vector<1x32xbf16>
    %c6_85 = arith.constant 6 : index
    %c0_86 = arith.constant 0 : index
    %c0_87 = arith.constant 0 : index
    %135 = vector.load %arg6[%c6_85, %c0_86, %c0_87] : memref<25x32x128xbf16, #tpu.memory_space<vmem>>, vector<1x32x128xbf16>
    %136 = vector.shape_cast %135 : vector<1x32x128xbf16> to vector<32x128xbf16>
    %cst_88 = arith.constant dense<0.000000e+00> : vector<1x128xf32>
    %137 = tpu.matmul %134, %136, %cst_88 {dimension_numbers = #tpu.dot_dimension_numbers<[1], [0], [0], [1], [0, 0, 1, 1], [], []>} : vector<1x32xbf16>, vector<32x128xbf16>, vector<1x128xf32> -> vector<1x128xf32>
    %138 = arith.addf %132, %137 : vector<1x128xf32>
    %139 = vector.extract_strided_slice %95 {offsets = [7, 0], sizes = [1, 32], strides = [1, 1]} : vector<25x32xf32> to vector<1x32xf32>
    %140 = arith.truncf %139 : vector<1x32xf32> to vector<1x32xbf16>
    %c7_89 = arith.constant 7 : index
    %c0_90 = arith.constant 0 : index
    %c0_91 = arith.constant 0 : index
    %141 = vector.load %arg6[%c7_89, %c0_90, %c0_91] : memref<25x32x128xbf16, #tpu.memory_space<vmem>>, vector<1x32x128xbf16>
    %142 = vector.shape_cast %141 : vector<1x32x128xbf16> to vector<32x128xbf16>
    %cst_92 = arith.constant dense<0.000000e+00> : vector<1x128xf32>
    %143 = tpu.matmul %140, %142, %cst_92 {dimension_numbers = #tpu.dot_dimension_numbers<[1], [0], [0], [1], [0, 0, 1, 1], [], []>} : vector<1x32xbf16>, vector<32x128xbf16>, vector<1x128xf32> -> vector<1x128xf32>
    %144 = arith.addf %138, %143 : vector<1x128xf32>
    %145 = vector.extract_strided_slice %95 {offsets = [8, 0], sizes = [1, 32], strides = [1, 1]} : vector<25x32xf32> to vector<1x32xf32>
    %146 = arith.truncf %145 : vector<1x32xf32> to vector<1x32xbf16>
    %c8_93 = arith.constant 8 : index
    %c0_94 = arith.constant 0 : index
    %c0_95 = arith.constant 0 : index
    %147 = vector.load %arg6[%c8_93, %c0_94, %c0_95] : memref<25x32x128xbf16, #tpu.memory_space<vmem>>, vector<1x32x128xbf16>
    %148 = vector.shape_cast %147 : vector<1x32x128xbf16> to vector<32x128xbf16>
    %cst_96 = arith.constant dense<0.000000e+00> : vector<1x128xf32>
    %149 = tpu.matmul %146, %148, %cst_96 {dimension_numbers = #tpu.dot_dimension_numbers<[1], [0], [0], [1], [0, 0, 1, 1], [], []>} : vector<1x32xbf16>, vector<32x128xbf16>, vector<1x128xf32> -> vector<1x128xf32>
    %150 = arith.addf %144, %149 : vector<1x128xf32>
    %151 = vector.extract_strided_slice %95 {offsets = [9, 0], sizes = [1, 32], strides = [1, 1]} : vector<25x32xf32> to vector<1x32xf32>
    %152 = arith.truncf %151 : vector<1x32xf32> to vector<1x32xbf16>
    %c9_97 = arith.constant 9 : index
    %c0_98 = arith.constant 0 : index
    %c0_99 = arith.constant 0 : index
    %153 = vector.load %arg6[%c9_97, %c0_98, %c0_99] : memref<25x32x128xbf16, #tpu.memory_space<vmem>>, vector<1x32x128xbf16>
    %154 = vector.shape_cast %153 : vector<1x32x128xbf16> to vector<32x128xbf16>
    %cst_100 = arith.constant dense<0.000000e+00> : vector<1x128xf32>
    %155 = tpu.matmul %152, %154, %cst_100 {dimension_numbers = #tpu.dot_dimension_numbers<[1], [0], [0], [1], [0, 0, 1, 1], [], []>} : vector<1x32xbf16>, vector<32x128xbf16>, vector<1x128xf32> -> vector<1x128xf32>
    %156 = arith.addf %150, %155 : vector<1x128xf32>
    %157 = vector.extract_strided_slice %95 {offsets = [10, 0], sizes = [1, 32], strides = [1, 1]} : vector<25x32xf32> to vector<1x32xf32>
    %158 = arith.truncf %157 : vector<1x32xf32> to vector<1x32xbf16>
    %c10_101 = arith.constant 10 : index
    %c0_102 = arith.constant 0 : index
    %c0_103 = arith.constant 0 : index
    %159 = vector.load %arg6[%c10_101, %c0_102, %c0_103] : memref<25x32x128xbf16, #tpu.memory_space<vmem>>, vector<1x32x128xbf16>
    %160 = vector.shape_cast %159 : vector<1x32x128xbf16> to vector<32x128xbf16>
    %cst_104 = arith.constant dense<0.000000e+00> : vector<1x128xf32>
    %161 = tpu.matmul %158, %160, %cst_104 {dimension_numbers = #tpu.dot_dimension_numbers<[1], [0], [0], [1], [0, 0, 1, 1], [], []>} : vector<1x32xbf16>, vector<32x128xbf16>, vector<1x128xf32> -> vector<1x128xf32>
    %162 = arith.addf %156, %161 : vector<1x128xf32>
    %163 = vector.extract_strided_slice %95 {offsets = [11, 0], sizes = [1, 32], strides = [1, 1]} : vector<25x32xf32> to vector<1x32xf32>
    %164 = arith.truncf %163 : vector<1x32xf32> to vector<1x32xbf16>
    %c11_105 = arith.constant 11 : index
    %c0_106 = arith.constant 0 : index
    %c0_107 = arith.constant 0 : index
    %165 = vector.load %arg6[%c11_105, %c0_106, %c0_107] : memref<25x32x128xbf16, #tpu.memory_space<vmem>>, vector<1x32x128xbf16>
    %166 = vector.shape_cast %165 : vector<1x32x128xbf16> to vector<32x128xbf16>
    %cst_108 = arith.constant dense<0.000000e+00> : vector<1x128xf32>
    %167 = tpu.matmul %164, %166, %cst_108 {dimension_numbers = #tpu.dot_dimension_numbers<[1], [0], [0], [1], [0, 0, 1, 1], [], []>} : vector<1x32xbf16>, vector<32x128xbf16>, vector<1x128xf32> -> vector<1x128xf32>
    %168 = arith.addf %162, %167 : vector<1x128xf32>
    %169 = vector.extract_strided_slice %95 {offsets = [12, 0], sizes = [1, 32], strides = [1, 1]} : vector<25x32xf32> to vector<1x32xf32>
    %170 = arith.truncf %169 : vector<1x32xf32> to vector<1x32xbf16>
    %c12_109 = arith.constant 12 : index
    %c0_110 = arith.constant 0 : index
    %c0_111 = arith.constant 0 : index
    %171 = vector.load %arg6[%c12_109, %c0_110, %c0_111] : memref<25x32x128xbf16, #tpu.memory_space<vmem>>, vector<1x32x128xbf16>
    %172 = vector.shape_cast %171 : vector<1x32x128xbf16> to vector<32x128xbf16>
    %cst_112 = arith.constant dense<0.000000e+00> : vector<1x128xf32>
    %173 = tpu.matmul %170, %172, %cst_112 {dimension_numbers = #tpu.dot_dimension_numbers<[1], [0], [0], [1], [0, 0, 1, 1], [], []>} : vector<1x32xbf16>, vector<32x128xbf16>, vector<1x128xf32> -> vector<1x128xf32>
    %174 = arith.addf %168, %173 : vector<1x128xf32>
    %175 = vector.extract_strided_slice %95 {offsets = [13, 0], sizes = [1, 32], strides = [1, 1]} : vector<25x32xf32> to vector<1x32xf32>
    %176 = arith.truncf %175 : vector<1x32xf32> to vector<1x32xbf16>
    %c13_113 = arith.constant 13 : index
    %c0_114 = arith.constant 0 : index
    %c0_115 = arith.constant 0 : index
    %177 = vector.load %arg6[%c13_113, %c0_114, %c0_115] : memref<25x32x128xbf16, #tpu.memory_space<vmem>>, vector<1x32x128xbf16>
    %178 = vector.shape_cast %177 : vector<1x32x128xbf16> to vector<32x128xbf16>
    %cst_116 = arith.constant dense<0.000000e+00> : vector<1x128xf32>
    %179 = tpu.matmul %176, %178, %cst_116 {dimension_numbers = #tpu.dot_dimension_numbers<[1], [0], [0], [1], [0, 0, 1, 1], [], []>} : vector<1x32xbf16>, vector<32x128xbf16>, vector<1x128xf32> -> vector<1x128xf32>
    %180 = arith.addf %174, %179 : vector<1x128xf32>
    %181 = vector.extract_strided_slice %95 {offsets = [14, 0], sizes = [1, 32], strides = [1, 1]} : vector<25x32xf32> to vector<1x32xf32>
    %182 = arith.truncf %181 : vector<1x32xf32> to vector<1x32xbf16>
    %c14_117 = arith.constant 14 : index
    %c0_118 = arith.constant 0 : index
    %c0_119 = arith.constant 0 : index
    %183 = vector.load %arg6[%c14_117, %c0_118, %c0_119] : memref<25x32x128xbf16, #tpu.memory_space<vmem>>, vector<1x32x128xbf16>
    %184 = vector.shape_cast %183 : vector<1x32x128xbf16> to vector<32x128xbf16>
    %cst_120 = arith.constant dense<0.000000e+00> : vector<1x128xf32>
    %185 = tpu.matmul %182, %184, %cst_120 {dimension_numbers = #tpu.dot_dimension_numbers<[1], [0], [0], [1], [0, 0, 1, 1], [], []>} : vector<1x32xbf16>, vector<32x128xbf16>, vector<1x128xf32> -> vector<1x128xf32>
    %186 = arith.addf %180, %185 : vector<1x128xf32>
    %187 = vector.extract_strided_slice %95 {offsets = [15, 0], sizes = [1, 32], strides = [1, 1]} : vector<25x32xf32> to vector<1x32xf32>
    %188 = arith.truncf %187 : vector<1x32xf32> to vector<1x32xbf16>
    %c15_121 = arith.constant 15 : index
    %c0_122 = arith.constant 0 : index
    %c0_123 = arith.constant 0 : index
    %189 = vector.load %arg6[%c15_121, %c0_122, %c0_123] : memref<25x32x128xbf16, #tpu.memory_space<vmem>>, vector<1x32x128xbf16>
    %190 = vector.shape_cast %189 : vector<1x32x128xbf16> to vector<32x128xbf16>
    %cst_124 = arith.constant dense<0.000000e+00> : vector<1x128xf32>
    %191 = tpu.matmul %188, %190, %cst_124 {dimension_numbers = #tpu.dot_dimension_numbers<[1], [0], [0], [1], [0, 0, 1, 1], [], []>} : vector<1x32xbf16>, vector<32x128xbf16>, vector<1x128xf32> -> vector<1x128xf32>
    %192 = arith.addf %186, %191 : vector<1x128xf32>
    %193 = vector.extract_strided_slice %95 {offsets = [16, 0], sizes = [1, 32], strides = [1, 1]} : vector<25x32xf32> to vector<1x32xf32>
    %194 = arith.truncf %193 : vector<1x32xf32> to vector<1x32xbf16>
    %c16 = arith.constant 16 : index
    %c0_125 = arith.constant 0 : index
    %c0_126 = arith.constant 0 : index
    %195 = vector.load %arg6[%c16, %c0_125, %c0_126] : memref<25x32x128xbf16, #tpu.memory_space<vmem>>, vector<1x32x128xbf16>
    %196 = vector.shape_cast %195 : vector<1x32x128xbf16> to vector<32x128xbf16>
    %cst_127 = arith.constant dense<0.000000e+00> : vector<1x128xf32>
    %197 = tpu.matmul %194, %196, %cst_127 {dimension_numbers = #tpu.dot_dimension_numbers<[1], [0], [0], [1], [0, 0, 1, 1], [], []>} : vector<1x32xbf16>, vector<32x128xbf16>, vector<1x128xf32> -> vector<1x128xf32>
    %198 = arith.addf %192, %197 : vector<1x128xf32>
    %199 = vector.extract_strided_slice %95 {offsets = [17, 0], sizes = [1, 32], strides = [1, 1]} : vector<25x32xf32> to vector<1x32xf32>
    %200 = arith.truncf %199 : vector<1x32xf32> to vector<1x32xbf16>
    %c17 = arith.constant 17 : index
    %c0_128 = arith.constant 0 : index
    %c0_129 = arith.constant 0 : index
    %201 = vector.load %arg6[%c17, %c0_128, %c0_129] : memref<25x32x128xbf16, #tpu.memory_space<vmem>>, vector<1x32x128xbf16>
    %202 = vector.shape_cast %201 : vector<1x32x128xbf16> to vector<32x128xbf16>
    %cst_130 = arith.constant dense<0.000000e+00> : vector<1x128xf32>
    %203 = tpu.matmul %200, %202, %cst_130 {dimension_numbers = #tpu.dot_dimension_numbers<[1], [0], [0], [1], [0, 0, 1, 1], [], []>} : vector<1x32xbf16>, vector<32x128xbf16>, vector<1x128xf32> -> vector<1x128xf32>
    %204 = arith.addf %198, %203 : vector<1x128xf32>
    %205 = vector.extract_strided_slice %95 {offsets = [18, 0], sizes = [1, 32], strides = [1, 1]} : vector<25x32xf32> to vector<1x32xf32>
    %206 = arith.truncf %205 : vector<1x32xf32> to vector<1x32xbf16>
    %c18 = arith.constant 18 : index
    %c0_131 = arith.constant 0 : index
    %c0_132 = arith.constant 0 : index
    %207 = vector.load %arg6[%c18, %c0_131, %c0_132] : memref<25x32x128xbf16, #tpu.memory_space<vmem>>, vector<1x32x128xbf16>
    %208 = vector.shape_cast %207 : vector<1x32x128xbf16> to vector<32x128xbf16>
    %cst_133 = arith.constant dense<0.000000e+00> : vector<1x128xf32>
    %209 = tpu.matmul %206, %208, %cst_133 {dimension_numbers = #tpu.dot_dimension_numbers<[1], [0], [0], [1], [0, 0, 1, 1], [], []>} : vector<1x32xbf16>, vector<32x128xbf16>, vector<1x128xf32> -> vector<1x128xf32>
    %210 = arith.addf %204, %209 : vector<1x128xf32>
    %211 = vector.extract_strided_slice %95 {offsets = [19, 0], sizes = [1, 32], strides = [1, 1]} : vector<25x32xf32> to vector<1x32xf32>
    %212 = arith.truncf %211 : vector<1x32xf32> to vector<1x32xbf16>
    %c19 = arith.constant 19 : index
    %c0_134 = arith.constant 0 : index
    %c0_135 = arith.constant 0 : index
    %213 = vector.load %arg6[%c19, %c0_134, %c0_135] : memref<25x32x128xbf16, #tpu.memory_space<vmem>>, vector<1x32x128xbf16>
    %214 = vector.shape_cast %213 : vector<1x32x128xbf16> to vector<32x128xbf16>
    %cst_136 = arith.constant dense<0.000000e+00> : vector<1x128xf32>
    %215 = tpu.matmul %212, %214, %cst_136 {dimension_numbers = #tpu.dot_dimension_numbers<[1], [0], [0], [1], [0, 0, 1, 1], [], []>} : vector<1x32xbf16>, vector<32x128xbf16>, vector<1x128xf32> -> vector<1x128xf32>
    %216 = arith.addf %210, %215 : vector<1x128xf32>
    %217 = vector.extract_strided_slice %95 {offsets = [20, 0], sizes = [1, 32], strides = [1, 1]} : vector<25x32xf32> to vector<1x32xf32>
    %218 = arith.truncf %217 : vector<1x32xf32> to vector<1x32xbf16>
    %c20 = arith.constant 20 : index
    %c0_137 = arith.constant 0 : index
    %c0_138 = arith.constant 0 : index
    %219 = vector.load %arg6[%c20, %c0_137, %c0_138] : memref<25x32x128xbf16, #tpu.memory_space<vmem>>, vector<1x32x128xbf16>
    %220 = vector.shape_cast %219 : vector<1x32x128xbf16> to vector<32x128xbf16>
    %cst_139 = arith.constant dense<0.000000e+00> : vector<1x128xf32>
    %221 = tpu.matmul %218, %220, %cst_139 {dimension_numbers = #tpu.dot_dimension_numbers<[1], [0], [0], [1], [0, 0, 1, 1], [], []>} : vector<1x32xbf16>, vector<32x128xbf16>, vector<1x128xf32> -> vector<1x128xf32>
    %222 = arith.addf %216, %221 : vector<1x128xf32>
    %223 = vector.extract_strided_slice %95 {offsets = [21, 0], sizes = [1, 32], strides = [1, 1]} : vector<25x32xf32> to vector<1x32xf32>
    %224 = arith.truncf %223 : vector<1x32xf32> to vector<1x32xbf16>
    %c21 = arith.constant 21 : index
    %c0_140 = arith.constant 0 : index
    %c0_141 = arith.constant 0 : index
    %225 = vector.load %arg6[%c21, %c0_140, %c0_141] : memref<25x32x128xbf16, #tpu.memory_space<vmem>>, vector<1x32x128xbf16>
    %226 = vector.shape_cast %225 : vector<1x32x128xbf16> to vector<32x128xbf16>
    %cst_142 = arith.constant dense<0.000000e+00> : vector<1x128xf32>
    %227 = tpu.matmul %224, %226, %cst_142 {dimension_numbers = #tpu.dot_dimension_numbers<[1], [0], [0], [1], [0, 0, 1, 1], [], []>} : vector<1x32xbf16>, vector<32x128xbf16>, vector<1x128xf32> -> vector<1x128xf32>
    %228 = arith.addf %222, %227 : vector<1x128xf32>
    %229 = vector.extract_strided_slice %95 {offsets = [22, 0], sizes = [1, 32], strides = [1, 1]} : vector<25x32xf32> to vector<1x32xf32>
    %230 = arith.truncf %229 : vector<1x32xf32> to vector<1x32xbf16>
    %c22 = arith.constant 22 : index
    %c0_143 = arith.constant 0 : index
    %c0_144 = arith.constant 0 : index
    %231 = vector.load %arg6[%c22, %c0_143, %c0_144] : memref<25x32x128xbf16, #tpu.memory_space<vmem>>, vector<1x32x128xbf16>
    %232 = vector.shape_cast %231 : vector<1x32x128xbf16> to vector<32x128xbf16>
    %cst_145 = arith.constant dense<0.000000e+00> : vector<1x128xf32>
    %233 = tpu.matmul %230, %232, %cst_145 {dimension_numbers = #tpu.dot_dimension_numbers<[1], [0], [0], [1], [0, 0, 1, 1], [], []>} : vector<1x32xbf16>, vector<32x128xbf16>, vector<1x128xf32> -> vector<1x128xf32>
    %234 = arith.addf %228, %233 : vector<1x128xf32>
    %235 = vector.extract_strided_slice %95 {offsets = [23, 0], sizes = [1, 32], strides = [1, 1]} : vector<25x32xf32> to vector<1x32xf32>
    %236 = arith.truncf %235 : vector<1x32xf32> to vector<1x32xbf16>
    %c23 = arith.constant 23 : index
    %c0_146 = arith.constant 0 : index
    %c0_147 = arith.constant 0 : index
    %237 = vector.load %arg6[%c23, %c0_146, %c0_147] : memref<25x32x128xbf16, #tpu.memory_space<vmem>>, vector<1x32x128xbf16>
    %238 = vector.shape_cast %237 : vector<1x32x128xbf16> to vector<32x128xbf16>
    %cst_148 = arith.constant dense<0.000000e+00> : vector<1x128xf32>
    %239 = tpu.matmul %236, %238, %cst_148 {dimension_numbers = #tpu.dot_dimension_numbers<[1], [0], [0], [1], [0, 0, 1, 1], [], []>} : vector<1x32xbf16>, vector<32x128xbf16>, vector<1x128xf32> -> vector<1x128xf32>
    %240 = arith.addf %234, %239 : vector<1x128xf32>
    %241 = vector.extract_strided_slice %95 {offsets = [24, 0], sizes = [1, 32], strides = [1, 1]} : vector<25x32xf32> to vector<1x32xf32>
    %242 = arith.truncf %241 : vector<1x32xf32> to vector<1x32xbf16>
    %c24 = arith.constant 24 : index
    %c0_149 = arith.constant 0 : index
    %c0_150 = arith.constant 0 : index
    %243 = vector.load %arg6[%c24, %c0_149, %c0_150] : memref<25x32x128xbf16, #tpu.memory_space<vmem>>, vector<1x32x128xbf16>
    %244 = vector.shape_cast %243 : vector<1x32x128xbf16> to vector<32x128xbf16>
    %cst_151 = arith.constant dense<0.000000e+00> : vector<1x128xf32>
    %245 = tpu.matmul %242, %244, %cst_151 {dimension_numbers = #tpu.dot_dimension_numbers<[1], [0], [0], [1], [0, 0, 1, 1], [], []>} : vector<1x32xbf16>, vector<32x128xbf16>, vector<1x128xf32> -> vector<1x128xf32>
    %246 = arith.addf %240, %245 : vector<1x128xf32>
    %c0_152 = arith.constant 0 : index
    %c0_153 = arith.constant 0 : index
    %247 = vector.load %arg7[%c0_152, %c0_153] : memref<1x128xf32, #tpu.memory_space<vmem>>, vector<1x128xf32>
    %248 = arith.addf %246, %247 : vector<1x128xf32>
    %cst_154 = arith.constant 0.000000e+00 : f32
    %249 = vector.broadcast %cst_154 : f32 to vector<1x128xf32>
    %250 = arith.maximumf %248, %249 : vector<1x128xf32>
    %251 = arith.truncf %250 : vector<1x128xf32> to vector<1x128xbf16>
    %c0_155 = arith.constant 0 : index
    %c0_156 = arith.constant 0 : index
    %252 = vector.load %arg8[%c0_155, %c0_156] : memref<128x128xbf16, #tpu.memory_space<vmem>>, vector<128x128xbf16>
    %cst_157 = arith.constant dense<0.000000e+00> : vector<1x128xf32>
    %253 = tpu.matmul %251, %252, %cst_157 {dimension_numbers = #tpu.dot_dimension_numbers<[1], [0], [0], [1], [0, 0, 1, 1], [], []>} : vector<1x128xbf16>, vector<128x128xbf16>, vector<1x128xf32> -> vector<1x128xf32>
    %c0_158 = arith.constant 0 : index
    %c0_159 = arith.constant 0 : index
    %254 = vector.load %arg9[%c0_158, %c0_159] : memref<1x128xf32, #tpu.memory_space<vmem>>, vector<1x128xf32>
    %255 = arith.addf %253, %254 : vector<1x128xf32>
    %c0_160 = arith.constant 0 : index
    %c0_161 = arith.constant 0 : index
    %c0_162 = arith.constant 0 : index
    %256 = vector.load %arg10[%c0_160, %c0_161, %c0_162] : memref<1x1x128xf32, #tpu.memory_space<vmem>>, vector<1x1x128xf32>
    %257 = vector.shape_cast %256 : vector<1x1x128xf32> to vector<1x128xf32>
    %258 = vector.shape_cast %255 : vector<1x128xf32> to vector<1x1x128xf32>
    tpu.vector_store %arg10[%c0_160, %c0_161, %c0_162], %258 {strides = array<i32>} : memref<1x1x128xf32, #tpu.memory_space<vmem>>, vector<1x1x128xf32>,
    return
  }
  func.func @transform_0(%arg0: i32) -> (i32, i32, i32) {
    %c0_i32 = arith.constant 0 : i32
    %c0_i32_0 = arith.constant 0 : i32
    %c0_i32_1 = arith.constant 0 : i32
    return %arg0, %c0_i32, %c0_i32_0 : i32, i32, i32
  }
  func.func @transform_1(%arg0: i32) -> (i32, i32) {
    %c0_i32 = arith.constant 0 : i32
    %c0_i32_0 = arith.constant 0 : i32
    %c0_i32_1 = arith.constant 0 : i32
    return %c0_i32, %c0_i32_0 : i32, i32
  }
  func.func @transform_2(%arg0: i32) -> (i32, i32) {
    %c0_i32 = arith.constant 0 : i32
    %c0_i32_0 = arith.constant 0 : i32
    %c0_i32_1 = arith.constant 0 : i32
    return %c0_i32, %c0_i32_0 : i32, i32
  }
  func.func @transform_3(%arg0: i32) -> (i32, i32, i32) {
    %c0_i32 = arith.constant 0 : i32
    %c0_i32_0 = arith.constant 0 : i32
    %c0_i32_1 = arith.constant 0 : i32
    %c0_i32_2 = arith.constant 0 : i32
    return %c0_i32, %c0_i32_0, %c0_i32_1 : i32, i32, i32
  }
  func.func @transform_4(%arg0: i32) -> (i32, i32) {
    %c0_i32 = arith.constant 0 : i32
    %c0_i32_0 = arith.constant 0 : i32
    %c0_i32_1 = arith.constant 0 : i32
    return %c0_i32, %c0_i32_0 : i32, i32
  }
  func.func @transform_5(%arg0: i32) -> (i32, i32, i32) {
    %c0_i32 = arith.constant 0 : i32
    %c0_i32_0 = arith.constant 0 : i32
    %c0_i32_1 = arith.constant 0 : i32
    %c0_i32_2 = arith.constant 0 : i32
    return %c0_i32, %c0_i32_0, %c0_i32_1 : i32, i32, i32
  }
  func.func @transform_6(%arg0: i32) -> (i32, i32) {
    %c0_i32 = arith.constant 0 : i32
    %c0_i32_0 = arith.constant 0 : i32
    %c0_i32_1 = arith.constant 0 : i32
    return %c0_i32, %c0_i32_0 : i32, i32
  }
  func.func @transform_7(%arg0: i32) -> (i32, i32) {
    %c0_i32 = arith.constant 0 : i32
    %c0_i32_0 = arith.constant 0 : i32
    %c0_i32_1 = arith.constant 0 : i32
    return %c0_i32, %c0_i32_0 : i32, i32
  }
  func.func @transform_8(%arg0: i32) -> (i32, i32) {
    %c0_i32 = arith.constant 0 : i32
    %c0_i32_0 = arith.constant 0 : i32
    %c0_i32_1 = arith.constant 0 : i32
    return %c0_i32, %c0_i32_0 : i32, i32
  }
  func.func @transform_9(%arg0: i32) -> (i32, i32, i32) {
    %c0_i32 = arith.constant 0 : i32
    %c0_i32_0 = arith.constant 0 : i32
    %c0_i32_1 = arith.constant 0 : i32
    return %arg0, %c0_i32, %c0_i32_0 : i32, i32, i32
  }
}

</mosaic_0001>

<bundles_post_ra>
// kernel: cnn_forward.1
= control target key start
LH: loop header
LB: loop body
LE: loop exit
PB: predicated region body
PF: predicated region fallthrough
CT: control target
= control target key end

     0   :  { %14 = vsyncpa [#allocation3], 0  ;;  %s6064_s0 = inlined_call_operand.vmem [shape: bf16[2,512,16], index: 0, kind: input, shape index: {}]   ;;  %s6065_s1 = inlined_call_operand.vmem [shape: bf16[16,32], index: 1, kind: input, shape index: {}]   ;;  %s6066_s2 = inlined_call_operand.vmem [shape: f32[1,32], index: 2, kind: input, shape index: {}]   ;;  %s6067_s3 = inlined_call_operand.vmem [shape: bf16[16,32,32], index: 3, kind: input, shape index: {}]   ;;  %s6068_s4 = inlined_call_operand.vmem [shape: f32[1,32], index: 4, kind: input, shape index: {}]   ;;  %s6069_s5 = inlined_call_operand.vmem [shape: bf16[25,32,128], index: 5, kind: input, shape index: {}]   ;;  %s6070_s6 = inlined_call_operand.vmem [shape: f32[1,128], index: 6, kind: input, shape index: {}]   ;;  %s6071_s7 = inlined_call_operand.vmem [shape: bf16[128,128], index: 7, kind: input, shape index: {}]   ;;  %s6072_s8 = inlined_call_operand.vmem [shape: f32[1,128], index: 8, kind: input, shape index: {}]   ;;  %s6073_s9 = inlined_call_operand.hbm [shape: f32[2,1,128], index: 9, kind: output, shape index: {}]  }
   0x1   :  { %16 = vsyncpa [#allocation3 + $0x1], 0  ;;  %s5322_s30 = smov 0   ;;  %s5324_s10 = smov 0  }
   0x2   :  { %s5326_s11 = smov 0   ;;  %s5328_s12 = smov 0  }
   0x3 LB: > { %s5343_s13 = sadd.s32 4294967295, %s5267_s12   ;;  %s4006_s14 = sadd.s32 4294967294, %s5267_s12   ;;  %s5267_s12 = sphi %s5328_s12, %s6079_s12   ;;  %s5263_s11 = sphi %s5326_s11, %s6078_s11   ;;  %s5259_s10 = sphi %s5324_s10, %s6077_s10   ;;  %s5255_s30 = sphi %s5322_s30, %s6076_s30  }
   0x4   : > { %s5347_s15 = sadd.s32 1, %s5267_s12   ;;  %s223_s16 = sadd.s32 1, %s5263_s11 }
   0x5   : > { %s220_s17 = ssub.s32 %s5267_s12, %s5347_s15  ;;  %p233_p0 = scmp.ne.s32.totalorder %s5263_s11, %s5259_s10 }
   0x6   : > { %p221_p1 = scmp.eq.s32.totalorder %s220_s17, 0  ;;  %p234_p2 = scmp.eq.s32.totalorder %s5343_s13, 1 }
   0x7   : > { %p239_p3 = scmp.ne.s32.totalorder %s5259_s10, %s5255_s30  ;;  %p240_p4 = scmp.eq.s32.totalorder %s4006_s14, 1 }
   0x8   : > { %s5358_s18 = scalar_select %p221_p1, %s5263_s11, %s223_s16  }
   0x9   : > { %p5360_p5 = por %p234_p2, %p233_p0  ;;  %p5364_p6 = por %p240_p4, %p239_p3 }
   0xa   : > { %p4009_p7 = scmp.ge.s32.totalorder %s5267_s12, 1  ;;  %p290_p8 = scmp.lt.s32.totalorder %s5267_s12, 3 }
   0xc   : > { %p291_p9 = pnand %p4009_p7, %p290_p8 }
   0xd   : > { %v5082_v0 = vld [vmem:[%s6065_s1] sm:$0xff] (!%p291_p9)   ;;  %p325_p10 = scmp.lt.s32.totalorder (!%p291_p9), %s5343_s13, 1  ;;  %vm570_vm0 = vcmask (!%p291_p9), 130048   ;;  %v5115_v27 = vld [vmem:[%s6067_s3 + $0x10] sm:$0xff] (!%p291_p9)   ;;  %v5116_v29 = vld [vmem:[%s6067_s3 + $0x18] sm:$0xff] (!%p291_p9)   ;;  %vm1073_vm1 = vcmask (!%p291_p9), 261120  }
   0xe   : > { %294 = sbr.rel (%p291_p9) target bundleno = 1188 (0x4a4), region = 56  ;;  %4567 = vmatprep.subr.bf16.mxu0 (!%p291_p9), %v5082_v0  ;;  %v5117_v31 = vld [vmem:[%s6067_s3 + $0x20] sm:$0xff] (!%p291_p9)   ;;  %v5118_v33 = vld [vmem:[%s6067_s3 + $0x28] sm:$0xff] (!%p291_p9)   ;;  %v5458_v37 = vld [vmem:[%s6067_s3 + $0x30] sm:$0xff] (!%p291_p9)   ;;  %vm5270_vm2 = vmmov (!%p291_p9), 0   ;;  %s323_s22 = sand.u32 (!%p291_p9), 1, %s5259_s10  }
   0xf   : > { %4568 = vmatpush3.bf16.msra.mxu0 (!%p291_p9), %v5082_v0  ;;  %4649 = vmatprep.subr.bf16.mxu1 (!%p291_p9), %v5117_v31  ;;  %v5119_v34 = vld [vmem:[%s6067_s3] sm:$0xff] (!%p291_p9)   ;;  %s4382_s25 = sshll.u32 (!%p291_p9), %s5343_s13, 4  ;;  %s324_s26 = scalar_lea.vmem (!%p291_p9), [#allocation2], %s323_s22 }
  0x10   : > { %4633 = vmatprep.subr.bf16.mxu0 (!%p291_p9), %v5115_v27  ;;  %4650 = vmatpush3.bf16.msra.mxu1 (!%p291_p9), %v5117_v31  ;;  %v5468_v39 = vld [vmem:[%s6066_s2] ss:$0 sm:$0xff] (!%p291_p9)  ;;  %s3951_s28 = sshll.u32 (!%p291_p9), %s324_s26, 4  ;;  %s3939_s16 = scalar_lea.sflag (!%p291_p9), [#allocation3], %s323_s22  ;;  %s6024_s28 = int_to_ptr.vmem [resolvable:$true] %s3951_s28 }
  0x11   : > { %4651 = vmatprep.subr.bf16.mxu1 (!%p291_p9), %v5118_v33  ;;  %v5123_v31 = vld [vmem:[%s6067_s3 + $0x40] sm:$0xff] (!%p291_p9)   ;;  %s5271_s17 = smov (!%p291_p9), [#allocation2]  }
  0x12   : > { %s5209_s21 = sshll.u32 (!%p291_p9), %s5271_s17, 4  ;;  %s5210_s21 = int_to_ptr.vmem [resolvable:$false] %s5209_s21 }
  0x13   : > { %p5212_p0 = scmp.lt.s32.totalorder (!%p291_p9), %s6024_s28, %s5210_s21 }
  0x14   : > { %4652 = vmatpush3.bf16.msra.mxu1 (!%p291_p9), %v5118_v33 }
  0x15   : > { %s326_s23 = scalar_select %p325_p10, %s5343_s13, 1  ;;  %4657 = vmatprep.subr.bf16.mxu1 %v5458_v37 }
  0x16   : > { %s5205_s13 = scalar_lea.vmem %s6024_s28, 16 }
  0x17   : > { %s4385_s24 = sshll.u32 %s326_s23, 8  ;;  %p5206_p11 = scmp.ne.s32.totalorder %s6024_s28, %s5205_s13 }
  0x18   : > { %s5378_s27 = scalar_lea.vmem %s6064_s0, %s4385_s24  ;;  %s5211_s23 = scalar_lea.vmem %s5210_s21, 32 }
  0x19   : > { %v5083_v1 = vld [vmem:[%s5378_s27] sm:$0xff]   ;;  %v5084_v2 = vld [vmem:[%s5378_s27 + $0x8] sm:$0xff]   ;;  %v5085_v3 = vld [vmem:[%s5378_s27 + $0x10] sm:$0xff]   ;;  %p5207_p12 = pnand %p5206_p11, %p5360_p5  ;;  %p5213_p1 = scmp.lt.s32.totalorder %s5211_s23, %s5205_s13 }
  0x1a   : > { %4569 = vmatprep.mubr.msk.bf16.mxu0 %vm570_vm0, %v5083_v1  ;;  %v5086_v4 = vld [vmem:[%s5378_s27 + $0x18] sm:$0xff]   ;;  %v5087_v5 = vld [vmem:[%s5378_s27 + $0x20] sm:$0xff]   ;;  %v5088_v6 = vld [vmem:[%s5378_s27 + $0x28] sm:$0xff]  }
  0x1b   : > { %4570 = vmatmul.mubr.msk.bf16.vlgmr.msra.gmra.mrb[0].mxu0 %vm570_vm0, %v5084_v2  ;;  %v5089_v7 = vld [vmem:[%s5378_s27 + $0x30] sm:$0xff]   ;;  %v5090_v8 = vld [vmem:[%s5378_s27 + $0x38] sm:$0xff]   ;;  %v5091_v9 = vld [vmem:[%s5378_s27 + $0x40] sm:$0xff]   ;;  %p5208_p13 = pneg %p5207_p12  ;;  %p5214_p2 = por %p5213_p1, %p5212_p0 }
  0x1c   : > { %4573 = vmatprep.mubr.msk.bf16.mxu0 %vm570_vm0, %v5085_v3  ;;  %v5092_v10 = vld [vmem:[%s5378_s27 + $0x48] sm:$0xff]   ;;  %v5093_v11 = vld [vmem:[%s5378_s27 + $0x50] sm:$0xff]   ;;  %v5094_v12 = vld [vmem:[%s5378_s27 + $0x58] sm:$0xff]   ;;  %4634 = vmatpush3.bf16.msra.mxu0 %v5115_v27 }
  0x1d   : > { %v5095_v13 = vld [vmem:[%s5378_s27 + $0x60] sm:$0xff]   ;;  %v5096_v14 = vld [vmem:[%s5378_s27 + $0x68] sm:$0xff]   ;;  %v5097_v15 = vld [vmem:[%s5378_s27 + $0x70] sm:$0xff]   ;;  %4635 = vmatprep.subr.bf16.mxu0 %v5116_v29  ;;  %p5215_p3 = pnand %p5214_p2, %p5208_p13 }
  0x1e   : > { %v5098_v16 = vld [vmem:[%s5378_s27 + $0x78] sm:$0xff]   ;;  %v5099_v17 = vld [vmem:[%s5378_s27 + $0x80] sm:$0xff]   ;;  %v5100_v18 = vld [vmem:[%s5378_s27 + $0x88] sm:$0xff]  }
  0x1f   : > { %v5101_v19 = vld [vmem:[%s5378_s27 + $0x90] sm:$0xff]   ;;  %v5102_v20 = vld [vmem:[%s5378_s27 + $0x98] sm:$0xff]   ;;  %v5103_v21 = vld [vmem:[%s5378_s27 + $0xa0] sm:$0xff]  }
  0x20   : > { %v5104_v22 = vld [vmem:[%s5378_s27 + $0xa8] sm:$0xff]   ;;  %v5105_v23 = vld [vmem:[%s5378_s27 + $0xb0] sm:$0xff]   ;;  %v5106_v24 = vld [vmem:[%s5378_s27 + $0xb8] sm:$0xff]   ;;  %4636 = vmatpush3.bf16.msra.mxu0 %v5116_v29 }
  0x21   : > { %v5107_v25 = vld [vmem:[%s5378_s27 + $0xc0] sm:$0xff]   ;;  %v5108_v26 = vld [vmem:[%s5378_s27 + $0xc8] sm:$0xff]   ;;  %v5109_v28 = vld [vmem:[%s5378_s27 + $0xd0] sm:$0xff]   ;;  %4641 = vmatprep.subr.bf16.mxu0 %v5119_v34 }
  0x22   : > { %v5110_v30 = vld [vmem:[%s5378_s27 + $0xd8] sm:$0xff]   ;;  %v5111_v32 = vld [vmem:[%s5378_s27 + $0xe0] sm:$0xff]   ;;  %v5112_v35 = vld [vmem:[%s5378_s27 + $0xe8] sm:$0xff]  }
  0x23   : > { %4574 = vmatmul.mubr.msk.bf16.gmra.mrb[4].mxu0 %vm570_vm0, %v5086_v4  ;;  %v5113_v36 = vld [vmem:[%s5378_s27 + $0xf0] sm:$0xff]   ;;  %v5114_v38 = vld [vmem:[%s5378_s27 + $0xf8] sm:$0xff]   ;;  %s6022_s27 = scalar_lea.hbm %s6073_s9, %s4382_s25 }
  0x24   : > { %4577 = vmatprep.mubr.msk.bf16.mxu0 %vm570_vm0, %v5087_v5 }
  0x2b   : > { %4578 = vmatmul.mubr.msk.bf16.gmra.mrb[8].mxu0 %vm570_vm0, %v5088_v6 }
  0x2c   : > { %4581 = vmatprep.mubr.msk.bf16.mxu0 %vm570_vm0, %v5089_v7  ;;  %v5121_v7 = vld [vmem:[%s6067_s3 + $0x8] sm:$0xff]  }
  0x33   : > { %4582 = vmatmul.mubr.msk.bf16.gmra.mrb[12].mxu0 %vm570_vm0, %v5090_v8 }
  0x34   : > { %4585 = vmatprep.mubr.msk.bf16.mxu0 %vm570_vm0, %v5091_v9 }
  0x3b   : > { %4586 = vmatmul.mubr.msk.bf16.gmra.mrb[16].mxu0 %vm570_vm0, %v5092_v10 }
  0x3c   : > { %4589 = vmatprep.mubr.msk.bf16.mxu0 %vm570_vm0, %v5093_v11 }
  0x43   : > { %4590 = vmatmul.mubr.msk.bf16.gmra.mrb[20].mxu0 %vm570_vm0, %v5094_v12 }
  0x44   : > { %4593 = vmatprep.mubr.msk.bf16.mxu0 %vm570_vm0, %v5095_v13 }
  0x4b   : > { %4594 = vmatmul.mubr.msk.bf16.gmra.mrb[24].mxu0 %vm570_vm0, %v5096_v14 }
  0x4c   : > { %4597 = vmatprep.mubr.msk.bf16.mxu0 %vm570_vm0, %v5097_v15 }
  0x53   : > { %4598 = vmatmul.mubr.msk.bf16.gmra.mrb[28].mxu0 %vm570_vm0, %v5098_v16 }
  0x54   : > { %4601 = vmatprep.mubr.msk.bf16.mxu0 %vm570_vm0, %v5099_v17 }
  0x5b   : > { %4602 = vmatmul.mubr.msk.bf16.gmra.mrb[32].mxu0 %vm570_vm0, %v5100_v18 }
  0x5c   : > { %4605 = vmatprep.mubr.msk.bf16.mxu0 %vm570_vm0, %v5101_v19 }
  0x63   : > { %4606 = vmatmul.mubr.msk.bf16.gmra.mrb[36].mxu0 %vm570_vm0, %v5102_v20 }
  0x64   : > { %4609 = vmatprep.mubr.msk.bf16.mxu0 %vm570_vm0, %v5103_v21 }
  0x6b   : > { %4610 = vmatmul.mubr.msk.bf16.gmra.mrb[40].mxu0 %vm570_vm0, %v5104_v22  ;;  %v5122_v22 = vld [vmem:[%s6067_s3 + $0x38] sm:$0xff]  }
  0x6c   : > { %4613 = vmatprep.mubr.msk.bf16.mxu0 %vm570_vm0, %v5105_v23 }
  0x73   : > { %4614 = vmatmul.mubr.msk.bf16.gmra.mrb[44].mxu0 %vm570_vm0, %v5106_v24 }
  0x74   : > { %4617 = vmatprep.mubr.msk.bf16.mxu0 %vm570_vm0, %v5107_v25 }
  0x7b   : > { %4618 = vmatmul.mubr.msk.bf16.gmra.mrb[48].mxu0 %vm570_vm0, %v5108_v26 }
  0x7c   : > { %4621 = vmatprep.mubr.msk.bf16.mxu0 %vm570_vm0, %v5109_v28 }
  0x83   : > { %4622 = vmatmul.mubr.msk.bf16.gmra.mrb[52].mxu0 %vm570_vm0, %v5110_v30 }
  0x84   : > { %4625 = vmatprep.mubr.msk.bf16.mxu0 %vm570_vm0, %v5111_v32 }
  0x8b   : > { %4626 = vmatmul.mubr.msk.bf16.gmra.mrb[56].mxu0 %vm570_vm0, %v5112_v35 }
  0x8c   : > { %4629 = vmatprep.mubr.msk.bf16.mxu0 %vm570_vm0, %v5113_v36 }
  0x93   : > { %4630 = vmatmul.mubr.msk.bf16.gmra.mrb[60].mxu0 %vm570_vm0, %v5114_v38 }
  0xee   : > { %v4571_v40 = vpop.f32.mrb[0].mxu0 }
  0xef   : > { %v710_v41 = vadd.f32 %v4571_v40, %v5468_v39  ;;  %v701_v42 = vpop.f32.mrb[1].mxu0 }
  0xf0   : > { %v702_v43 = vadd.f32 %v5468_v39, %v701_v42  ;;  %v4572_v44 = vpop.f32.mrb[2].mxu0 }
  0xf1   : > { %v713_v45 = vadd.f32 %v4572_v44, %v5468_v39  ;;  %v704_v46 = vpop.f32.mrb[3].mxu0  ;;  %v958_v48 = vmax.f32 %v710_v41, 0.0 }
  0xf2   : > { %v705_v47 = vadd.f32 %v5468_v39, %v704_v46  ;;  %v956_v50 = vmax.f32 %v702_v43, 0.0 }
  0xf3   : > { %v959_v49 = vmax.f32 %v713_v45, 0.0 }
  0xf4   : > { %v957_v51 = vmax.f32 %v705_v47, 0.0  ;;  %v5124_v47 = vld [vmem:[%s6067_s3 + $0x48] sm:$0xff]  }
  0xf5   : > { %v1021_v52 = vpack.c.bf16 %v959_v49, %v958_v48 }
  0xf6   : > { %v1020_v53 = vpack.c.bf16 %v957_v51, %v956_v50  ;;  %v4575_v54 = vpop.f32.mrb[4].mxu0 }
  0xf7   : > { %v726_v55 = vadd.f32 %v4575_v54, %v5468_v39  ;;  %v717_v56 = vpop.f32.mrb[5].mxu0  ;;  %v5125_v54 = vld [vmem:[%s6067_s3 + $0x50] sm:$0xff]  }
  0xf8   : > { %v718_v57 = vadd.f32 %v5468_v39, %v717_v56  ;;  %v4576_v58 = vpop.f32.mrb[6].mxu0 }
  0xf9   : > { %v729_v59 = vadd.f32 %v4576_v58, %v5468_v39  ;;  %v720_v60 = vpop.f32.mrb[7].mxu0  ;;  %v962_v62 = vmax.f32 %v726_v55, 0.0 }
  0xfa   : > { %v721_v61 = vadd.f32 %v5468_v39, %v720_v60  ;;  %v960_v0 = vmax.f32 %v718_v57, 0.0 }
  0xfb   : > { %v963_v63 = vmax.f32 %v729_v59, 0.0 }
  0xfc   : > { %v961_v1 = vmax.f32 %v721_v61, 0.0 }
  0xfd   : > { %v1023_v2 = vpack.c.bf16 %v963_v63, %v962_v62 }
  0xfe   : > { %v1022_v3 = vpack.c.bf16 %v961_v1, %v960_v0  ;;  %v4579_v4 = vpop.f32.mrb[8].mxu0 }
  0xff   : > { %v742_v5 = vadd.f32 %v4579_v4, %v5468_v39  ;;  %v733_v6 = vpop.f32.mrb[9].mxu0 }
 0x100   : > { %v734_v8 = vadd.f32 %v5468_v39, %v733_v6  ;;  %v4580_v9 = vpop.f32.mrb[10].mxu0  ;;  %4637 = vmatprep.mubr.msk.bf16.mxu0 %vm1073_vm1, %v1022_v3  ;;  %v5126_v3 = vld [vmem:[%s6067_s3 + $0x58] sm:$0xff]  }
 0x101   : > { %v745_v10 = vadd.f32 %v4580_v9, %v5468_v39  ;;  %v736_v11 = vpop.f32.mrb[11].mxu0  ;;  %4638 = vmatmul.mubr.msk.bf16.vlgmr.msra.gmra.mrb[64].mxu0 %vm1073_vm1, %v1023_v2  ;;  %v966_v13 = vmax.f32 %v742_v5, 0.0 }
 0x102   : > { %v737_v12 = vadd.f32 %v5468_v39, %v736_v11  ;;  %4645 = vmatprep.mubr.msk.bf16.mxu0 %vm1073_vm1, %v1020_v53  ;;  %4642 = vmatpush3.bf16.msra.mxu0 %v5119_v34  ;;  %v964_v15 = vmax.f32 %v734_v8, 0.0 }
 0x103   : > { %v967_v14 = vmax.f32 %v745_v10, 0.0  ;;  %4643 = vmatprep.subr.bf16.mxu0 %v5121_v7 }
 0x104   : > { %v965_v16 = vmax.f32 %v737_v12, 0.0 }
 0x105   : > { %v1025_v17 = vpack.c.bf16 %v967_v14, %v966_v13  ;;  %v5127_v13 = vld [vmem:[%s6067_s3 + $0x60] sm:$0xff]  }
 0x106   : > { %v4583_v18 = vpop.f32.mrb[12].mxu0  ;;  %v1024_v19 = vpack.c.bf16 %v965_v16, %v964_v15  ;;  %4644 = vmatpush3.bf16.msra.mxu0 %v5121_v7 }
 0x107   : > { %v758_v20 = vadd.f32 %v4583_v18, %v5468_v39  ;;  %v749_v21 = vpop.f32.mrb[13].mxu0 }
 0x108   : > { %v750_v23 = vadd.f32 %v5468_v39, %v749_v21  ;;  %4653 = vmatprep.mubr.msk.bf16.mxu1 %vm1073_vm1, %v1024_v19  ;;  %v4584_v24 = vpop.f32.mrb[14].mxu0 }
 0x109   : > { %v970_v25 = vmax.f32 %v758_v20, 0.0  ;;  %v761_v26 = vadd.f32 %v4584_v24, %v5468_v39  ;;  %4654 = vmatmul.mubr.msk.bf16.vlgmr.msra.gmra.mrb[0].mxu1 %vm1073_vm1, %v1025_v17  ;;  %v752_v27 = vpop.f32.mrb[15].mxu0 }
 0x10a   : > { %v968_v28 = vmax.f32 %v750_v23, 0.0  ;;  %4658 = vmatpush3.bf16.msra.mxu1 %v5458_v37  ;;  %v753_v29 = vadd.f32 %v5468_v39, %v752_v27 }
 0x10b   : > { %v971_v30 = vmax.f32 %v761_v26, 0.0  ;;  %4659 = vmatprep.subr.bf16.mxu1 %v5122_v22 }
 0x10c   : > { %v969_v32 = vmax.f32 %v753_v29, 0.0 }
 0x10d   : > { %v1027_v33 = vpack.c.bf16 %v971_v30, %v970_v25  ;;  %4646 = vmatmul.mubr.msk.bf16.vlgmr.msra.gmra.mrb[64].mxu0 %vm1073_vm1, %v1021_v52 }
 0x10e   : > { %v1026_v34 = vpack.c.bf16 %v969_v32, %v968_v28  ;;  %4660 = vmatpush3.bf16.msra.mxu1 %v5122_v22  ;;  %v4587_v35 = vpop.f32.mrb[16].mxu0  ;;  %v5128_v28 = vld [vmem:[%s6067_s3 + $0x68] sm:$0xff]  }
 0x10f   : > { %v774_v36 = vadd.f32 %v4587_v35, %v5468_v39  ;;  %v765_v38 = vpop.f32.mrb[17].mxu0  ;;  %4665 = vmatprep.subr.bf16.mxu1 %v5123_v31 }
 0x110   : > { %4661 = vmatprep.mubr.msk.bf16.mxu1 %vm1073_vm1, %v1026_v34  ;;  %v766_v37 = vadd.f32 %v5468_v39, %v765_v38  ;;  %v4588_v40 = vpop.f32.mrb[18].mxu0  ;;  %v5129_v34 = vld [vmem:[%s6067_s3 + $0x70] sm:$0xff]  }
 0x111   : > { %v974_v41 = vmax.f32 %v774_v36, 0.0  ;;  %v777_v42 = vadd.f32 %v4588_v40, %v5468_v39  ;;  %v768_v43 = vpop.f32.mrb[19].mxu0 }
 0x112   : > { %v972_v44 = vmax.f32 %v766_v37, 0.0  ;;  %v769_v45 = vadd.f32 %v5468_v39, %v768_v43 }
 0x113   : > { %v975_v46 = vmax.f32 %v777_v42, 0.0 }
 0x114   : > { %v973_v48 = vmax.f32 %v769_v45, 0.0 }
 0x115   : > { %v1029_v49 = vpack.c.bf16 %v975_v46, %v974_v41  ;;  %4662 = vmatmul.mubr.msk.bf16.vlgmr.msra.gmra.mrb[0].mxu1 %vm1073_vm1, %v1027_v33 }
 0x116   : > { %4666 = vmatpush3.bf16.msra.mxu1 %v5123_v31  ;;  %v1028_v50 = vpack.c.bf16 %v973_v48, %v972_v44  ;;  %v4591_v51 = vpop.f32.mrb[20].mxu0 }
 0x117   : > { %4667 = vmatprep.subr.bf16.mxu1 %v5124_v47  ;;  %v790_v52 = vadd.f32 %v4591_v51, %v5468_v39  ;;  %v781_v53 = vpop.f32.mrb[21].mxu0 }
 0x118   : > { %4669 = vmatprep.mubr.msk.bf16.mxu1 %vm1073_vm1, %v1028_v50  ;;  %v782_v55 = vadd.f32 %v5468_v39, %v781_v53  ;;  %v4592_v56 = vpop.f32.mrb[22].mxu0  ;;  %v5130_v50 = vld [vmem:[%s6067_s3 + $0x78] sm:$0xff]  }
 0x119   : > { %v978_v57 = vmax.f32 %v790_v52, 0.0  ;;  %v793_v58 = vadd.f32 %v4592_v56, %v5468_v39  ;;  %v784_v59 = vpop.f32.mrb[23].mxu0 }
 0x11a   : > { %4668 = vmatpush3.bf16.msra.mxu1 %v5124_v47  ;;  %v976_v60 = vmax.f32 %v782_v55, 0.0  ;;  %v785_v61 = vadd.f32 %v5468_v39, %v784_v59 }
 0x11b   : > { %4673 = vmatprep.subr.bf16.mxu1 %v5125_v54  ;;  %v979_v62 = vmax.f32 %v793_v58, 0.0 }
 0x11c   : > { %v977_v63 = vmax.f32 %v785_v61, 0.0 }
 0x11d   : > { %v1031_v0 = vpack.c.bf16 %v979_v62, %v978_v57 }
 0x11e   : > { %v1030_v1 = vpack.c.bf16 %v977_v63, %v976_v60  ;;  %v4595_v2 = vpop.f32.mrb[24].mxu0  ;;  %v5131_v60 = vld [vmem:[%s6067_s3 + $0x80] sm:$0xff]  }
 0x11f   : > { %v806_v4 = vadd.f32 %v4595_v2, %v5468_v39  ;;  %v797_v5 = vpop.f32.mrb[25].mxu0 }
 0x120   : > { %v798_v6 = vadd.f32 %v5468_v39, %v797_v5  ;;  %v4596_v7 = vpop.f32.mrb[26].mxu0 }
 0x121   : > { %4670 = vmatmul.mubr.msk.bf16.vlgmr.msra.gmra.mrb[0].mxu1 %vm1073_vm1, %v1029_v49  ;;  %v982_v8 = vmax.f32 %v806_v4, 0.0  ;;  %v809_v9 = vadd.f32 %v4596_v7, %v5468_v39  ;;  %v800_v10 = vpop.f32.mrb[27].mxu0 }
 0x122   : > { %4674 = vmatpush3.bf16.msra.mxu1 %v5125_v54  ;;  %4677 = vmatprep.mubr.msk.bf16.mxu1 %vm1073_vm1, %v1030_v1  ;;  %v980_v11 = vmax.f32 %v798_v6, 0.0  ;;  %v801_v12 = vadd.f32 %v5468_v39, %v800_v10 }
 0x123   : > { %4675 = vmatprep.subr.bf16.mxu1 %v5126_v3  ;;  %v983_v14 = vmax.f32 %v809_v9, 0.0 }
 0x124   : > { %v981_v15 = vmax.f32 %v801_v12, 0.0 }
 0x125   : > { %v1033_v16 = vpack.c.bf16 %v983_v14, %v982_v8 }
 0x126   : > { %4676 = vmatpush3.bf16.msra.mxu1 %v5126_v3  ;;  %v1032_v17 = vpack.c.bf16 %v981_v15, %v980_v11  ;;  %v4599_v18 = vpop.f32.mrb[28].mxu0  ;;  %v5132_v11 = vld [vmem:[%s6067_s3 + $0x88] sm:$0xff]  }
 0x127   : > { %4681 = vmatprep.subr.bf16.mxu1 %v5127_v13  ;;  %v822_v19 = vadd.f32 %v4599_v18, %v5468_v39  ;;  %v813_v20 = vpop.f32.mrb[29].mxu0 }
 0x128   : > { %v814_v21 = vadd.f32 %v5468_v39, %v813_v20  ;;  %v4600_v22 = vpop.f32.mrb[30].mxu0 }
 0x129   : > { %v986_v23 = vmax.f32 %v822_v19, 0.0  ;;  %v825_v24 = vadd.f32 %v4600_v22, %v5468_v39  ;;  %v816_v25 = vpop.f32.mrb[31].mxu0 }
 0x12a   : > { %v984_v26 = vmax.f32 %v814_v21, 0.0  ;;  %v817_v27 = vadd.f32 %v5468_v39, %v816_v25 }
 0x12b   : > { %v987_v29 = vmax.f32 %v825_v24, 0.0 }
 0x12c   : > { %v985_v30 = vmax.f32 %v817_v27, 0.0 }
 0x12d   : > { %4678 = vmatmul.mubr.msk.bf16.vlgmr.msra.gmra.mrb[0].mxu1 %vm1073_vm1, %v1031_v0  ;;  %v1035_v31 = vpack.c.bf16 %v987_v29, %v986_v23 }
 0x12e   : > { %4682 = vmatpush3.bf16.msra.mxu1 %v5127_v13  ;;  %4685 = vmatprep.mubr.msk.bf16.mxu1 %vm1073_vm1, %v1032_v17  ;;  %v1034_v32 = vpack.c.bf16 %v985_v30, %v984_v26  ;;  %v4603_v33 = vpop.f32.mrb[32].mxu0  ;;  %v5133_v17 = vld [vmem:[%s6067_s3 + $0x90] sm:$0xff]  }
 0x12f   : > { %4683 = vmatprep.subr.bf16.mxu1 %v5128_v28  ;;  %v838_v35 = vadd.f32 %v4603_v33, %v5468_v39  ;;  %v829_v36 = vpop.f32.mrb[33].mxu0 }
 0x130   : > { %v830_v38 = vadd.f32 %v5468_v39, %v829_v36  ;;  %v4604_v37 = vpop.f32.mrb[34].mxu0 }
 0x131   : > { %v990_v40 = vmax.f32 %v838_v35, 0.0  ;;  %v841_v41 = vadd.f32 %v4604_v37, %v5468_v39  ;;  %v832_v42 = vpop.f32.mrb[35].mxu0 }
 0x132   : > { %4684 = vmatpush3.bf16.msra.mxu1 %v5128_v28  ;;  %v988_v43 = vmax.f32 %v830_v38, 0.0  ;;  %v833_v44 = vadd.f32 %v5468_v39, %v832_v42 }
 0x133   : > { %4689 = vmatprep.subr.bf16.mxu1 %v5129_v34  ;;  %v991_v45 = vmax.f32 %v841_v41, 0.0 }
 0x134   : > { %v989_v46 = vmax.f32 %v833_v44, 0.0 }
 0x135   : > { %v5547_v47 = vpack.c.bf16 %v991_v45, %v990_v40 }
 0x136   : > { %v1036_v48 = vpack.c.bf16 %v989_v46, %v988_v43  ;;  %v4607_v49 = vpop.f32.mrb[36].mxu0  ;;  %v5135_v43 = vld [vmem:[%s6067_s3 + $0xa0] sm:$0xff]  }
 0x137   : > { %v854_v51 = vadd.f32 %v4607_v49, %v5468_v39  ;;  %v845_v52 = vpop.f32.mrb[37].mxu0 }
 0x138   : > { %v846_v53 = vadd.f32 %v5468_v39, %v845_v52  ;;  %v4608_v54 = vpop.f32.mrb[38].mxu0 }
 0x139   : > { %4686 = vmatmul.mubr.msk.bf16.vlgmr.msra.gmra.mrb[0].mxu1 %vm1073_vm1, %v1033_v16  ;;  %v994_v55 = vmax.f32 %v854_v51, 0.0  ;;  %v857_v56 = vadd.f32 %v4608_v54, %v5468_v39  ;;  %v848_v57 = vpop.f32.mrb[39].mxu0 }
 0x13a   : > { %4690 = vmatpush3.bf16.msra.mxu1 %v5129_v34  ;;  %4693 = vmatprep.mubr.msk.bf16.mxu1 %vm1073_vm1, %v1034_v32  ;;  %v992_v58 = vmax.f32 %v846_v53, 0.0  ;;  %v849_v59 = vadd.f32 %v5468_v39, %v848_v57  ;;  %v5134_v32 = vld [vmem:[%s6067_s3 + $0x98] sm:$0xff]  }
 0x13b   : > { %4691 = vmatprep.subr.bf16.mxu1 %v5130_v50  ;;  %v995_v61 = vmax.f32 %v857_v56, 0.0 }
 0x13c   : > { %v993_v62 = vmax.f32 %v849_v59, 0.0 }
 0x13d   : > { %v5561_v63 = vpack.c.bf16 %v995_v61, %v994_v55 }
 0x13e   : > { %4692 = vmatpush3.bf16.msra.mxu1 %v5130_v50  ;;  %v1038_v0 = vpack.c.bf16 %v993_v62, %v992_v58  ;;  %v4611_v1 = vpop.f32.mrb[40].mxu0  ;;  %v5136_v58 = vld [vmem:[%s6067_s3 + $0xa8] sm:$0xff]  }
 0x13f   : > { %4697 = vmatprep.subr.bf16.mxu1 %v5131_v60  ;;  %v870_v2 = vadd.f32 %v4611_v1, %v5468_v39  ;;  %v861_v3 = vpop.f32.mrb[41].mxu0  ;;  %v5137_v1 = vld [vmem:[%s6067_s3 + $0xb0] sm:$0xff]  }
 0x140   : > { %v862_v4 = vadd.f32 %v5468_v39, %v861_v3  ;;  %v4612_v5 = vpop.f32.mrb[42].mxu0 }
 0x141   : > { %v998_v6 = vmax.f32 %v870_v2, 0.0  ;;  %v873_v7 = vadd.f32 %v4612_v5, %v5468_v39  ;;  %v864_v8 = vpop.f32.mrb[43].mxu0 }
 0x142   : > { %v996_v9 = vmax.f32 %v862_v4, 0.0  ;;  %v865_v10 = vadd.f32 %v5468_v39, %v864_v8 }
 0x143   : > { %v999_v12 = vmax.f32 %v873_v7, 0.0 }
 0x144   : > { %v997_v13 = vmax.f32 %v865_v10, 0.0 }
 0x145   : > { %4694 = vmatmul.mubr.msk.bf16.vlgmr.msra.gmra.mrb[0].mxu1 %vm1073_vm1, %v1035_v31  ;;  %v5571_v14 = vpack.c.bf16 %v999_v12, %v998_v6 }
 0x146   : > { %4698 = vmatpush3.bf16.msra.mxu1 %v5131_v60  ;;  %4701 = vmatprep.mubr.msk.bf16.mxu1 %vm1073_vm1, %v1036_v48  ;;  %v1040_v15 = vpack.c.bf16 %v997_v13, %v996_v9  ;;  %v4615_v16 = vpop.f32.mrb[44].mxu0 }
 0x147   : > { %4699 = vmatprep.subr.bf16.mxu1 %v5132_v11  ;;  %v886_v18 = vadd.f32 %v4615_v16, %v5468_v39  ;;  %v877_v19 = vpop.f32.mrb[45].mxu0  ;;  %v5138_v16 = vld [vmem:[%s6067_s3 + $0xb8] sm:$0xff]  }
 0x148   : > { %v878_v20 = vadd.f32 %v5468_v39, %v877_v19  ;;  %v4616_v21 = vpop.f32.mrb[46].mxu0 }
 0x149   : > { %v1002_v22 = vmax.f32 %v886_v18, 0.0  ;;  %v889_v23 = vadd.f32 %v4616_v21, %v5468_v39  ;;  %v880_v24 = vpop.f32.mrb[47].mxu0 }
 0x14a   : > { %4700 = vmatpush3.bf16.msra.mxu1 %v5132_v11  ;;  %v1000_v25 = vmax.f32 %v878_v20, 0.0  ;;  %v881_v26 = vadd.f32 %v5468_v39, %v880_v24 }
 0x14b   : > { %4705 = vmatprep.subr.bf16.mxu1 %v5133_v17  ;;  %v1003_v27 = vmax.f32 %v889_v23, 0.0 }
 0x14c   : > { %v1001_v28 = vmax.f32 %v881_v26, 0.0  ;;  %v5139_v26 = vld [vmem:[%s6067_s3 + $0xc0] sm:$0xff]  }
 0x14d   : > { %v5581_v29 = vpack.c.bf16 %v1003_v27, %v1002_v22 }
 0x14e   : > { %v5583_v30 = vpack.c.bf16 %v1001_v28, %v1000_v25  ;;  %v4619_v31 = vpop.f32.mrb[48].mxu0 }
 0x14f   : > { %v902_v33 = vadd.f32 %v4619_v31, %v5468_v39  ;;  %v893_v34 = vpop.f32.mrb[49].mxu0 }
 0x150   : > { %v894_v35 = vadd.f32 %v5468_v39, %v893_v34  ;;  %v4620_v36 = vpop.f32.mrb[50].mxu0  ;;  %v5145_v34 = vld [vmem:[%s6067_s3 + $0xf0] sm:$0xff]  }
 0x151   : > { %4702 = vmatmul.mubr.msk.bf16.vlgmr.msra.gmra.mrb[0].mxu1 %vm1073_vm1, %v5547_v47  ;;  %v1006_v38 = vmax.f32 %v902_v33, 0.0  ;;  %v905_v37 = vadd.f32 %v4620_v36, %v5468_v39  ;;  %v896_v40 = vpop.f32.mrb[51].mxu0  ;;  %v5144_v33 = vld [vmem:[%s6067_s3 + $0xe8] sm:$0xff]  }
 0x152   : > { %4706 = vmatpush3.bf16.msra.mxu1 %v5133_v17  ;;  %4709 = vmatprep.mubr.msk.bf16.mxu1 %vm1073_vm1, %v1038_v0  ;;  %v1004_v41 = vmax.f32 %v894_v35, 0.0  ;;  %v897_v42 = vadd.f32 %v5468_v39, %v896_v40  ;;  %v5146_v35 = vld [vmem:[%s6067_s3 + $0xf8] sm:$0xff]  }
 0x153   : > { %4707 = vmatprep.subr.bf16.mxu1 %v5134_v32  ;;  %v1007_v44 = vmax.f32 %v905_v37, 0.0 }
 0x154   : > { %v1005_v45 = vmax.f32 %v897_v42, 0.0  ;;  %v5269_v42 = vmov 0.0  }
 0x155   : > { %v5598_v46 = vpack.c.bf16 %v1007_v44, %v1006_v38  ;;  %4761 = vmatprep.subr.bf16.mxu0 %v5269_v42  ;;  %v5149_v44 = vld [vmem:[%s6069_s5 + $0x8] sm:$0xff]   ;;  %4765 = vmatprep.mubr.msk.bf16.mxu0 %vm5270_vm2, %v5269_v42 }
 0x156   : > { %4708 = vmatpush3.bf16.msra.mxu1 %v5134_v32  ;;  %v5600_v47 = vpack.c.bf16 %v1005_v45, %v1004_v41  ;;  %v4623_v48 = vpop.f32.mrb[52].mxu0  ;;  %v5140_v32 = vld [vmem:[%s6067_s3 + $0xc8] sm:$0xff]   ;;  %v5147_v41 = vld [vmem:[%s6069_s5] sm:$0xff]   ;;  %v5150_v45 = vld [vmem:[%s6069_s5 + $0x18] sm:$0xff]  }
 0x157   : > { %4713 = vmatprep.subr.bf16.mxu1 %v5135_v43  ;;  %v918_v49 = vadd.f32 %v4623_v48, %v5468_v39  ;;  %v909_v50 = vpop.f32.mrb[53].mxu0  ;;  %v5693_v48 = vld [vmem:[%s6068_s4] ss:$0 sm:$0xff] }
 0x158   : > { %v910_v51 = vadd.f32 %v5468_v39, %v909_v50  ;;  %v4624_v52 = vpop.f32.mrb[54].mxu0 }
 0x159   : > { %v1010_v53 = vmax.f32 %v918_v49, 0.0  ;;  %v921_v54 = vadd.f32 %v4624_v52, %v5468_v39  ;;  %v912_v55 = vpop.f32.mrb[55].mxu0 }
 0x15a   : > { %v1008_v56 = vmax.f32 %v910_v51, 0.0  ;;  %v913_v57 = vadd.f32 %v5468_v39, %v912_v55 }
 0x15b   : > { %v1011_v59 = vmax.f32 %v921_v54, 0.0 }
 0x15c   : > { %v1009_v60 = vmax.f32 %v913_v57, 0.0 }
 0x15d   : > { %4710 = vmatmul.mubr.msk.bf16.vlgmr.msra.gmra.mrb[0].mxu1 %vm1073_vm1, %v5561_v63  ;;  %v1047_v61 = vpack.c.bf16 %v1011_v59, %v1010_v53 }
 0x15e   : > { %4714 = vmatpush3.bf16.msra.mxu1 %v5135_v43  ;;  %4717 = vmatprep.mubr.msk.bf16.mxu1 %vm1073_vm1, %v1040_v15  ;;  %v1046_v62 = vpack.c.bf16 %v1009_v60, %v1008_v56  ;;  %v4627_v0 = vpop.f32.mrb[56].mxu0  ;;  %v5148_v43 = vld [vmem:[%s6069_s5 + $0x10] sm:$0xff]   ;;  %v5152_v60 = vld [vmem:[%s6069_s5 + $0x20] sm:$0xff]  }
 0x15f   : > { %4715 = vmatprep.subr.bf16.mxu1 %v5136_v58  ;;  %v934_v2 = vadd.f32 %v4627_v0, %v5468_v39  ;;  %v925_v3 = vpop.f32.mrb[57].mxu0  ;;  %4762 = vmatpush3.bf16.msra.mxu0 %v5148_v43  ;;  %v5154_v0 = vld [vmem:[%s6069_s5 + $0x28] sm:$0xff]   ;;  %v5180_v43 = vld [vmem:[%s6069_s5 + $0x100] sm:$0xff]  }
 0x160   : > { %v926_v4 = vadd.f32 %v5468_v39, %v925_v3  ;;  %v4628_v5 = vpop.f32.mrb[58].mxu0  ;;  %4763 = vmatprep.subr.bf16.mxu0 %v5269_v42  ;;  %v5156_v3 = vld [vmem:[%s6069_s5 + $0x40] sm:$0xff]  }
 0x161   : > { %v1014_v6 = vmax.f32 %v934_v2, 0.0  ;;  %v937_v63 = vadd.f32 %v4628_v5, %v5468_v39  ;;  %v928_v7 = vpop.f32.mrb[59].mxu0  ;;  %v5157_v5 = vld [vmem:[%s6069_s5 + $0x58] sm:$0xff]  }
 0x162   : > { %4716 = vmatpush3.bf16.msra.mxu1 %v5136_v58  ;;  %v1012_v8 = vmax.f32 %v926_v4, 0.0  ;;  %v929_v9 = vadd.f32 %v5468_v39, %v928_v7  ;;  %v5151_v58 = vld [vmem:[%s6069_s5 + $0x30] sm:$0xff]  }
 0x163   : > { %4721 = vmatprep.subr.bf16.mxu1 %v5137_v1  ;;  %v1015_v10 = vmax.f32 %v937_v63, 0.0  ;;  %4764 = vmatpush3.bf16.msra.mxu0 %v5150_v45  ;;  %v5159_v63 = vld [vmem:[%s6069_s5 + $0x70] sm:$0xff]   ;;  %v5181_v45 = vld [vmem:[%s6069_s5 + $0x118] sm:$0xff]  }
 0x164   : > { %v1013_v11 = vmax.f32 %v929_v9, 0.0  ;;  %4777 = vmatprep.subr.bf16.mxu0 %v5269_v42 }
 0x165   : > { %v1049_v12 = vpack.c.bf16 %v1015_v10, %v1014_v6  ;;  %v5158_v6 = vld [vmem:[%s6069_s5 + $0x48] sm:$0xff]   ;;  %v5161_v10 = vld [vmem:[%s6069_s5 + $0x78] sm:$0xff]  }
 0x166   : > { %v1048_v13 = vpack.c.bf16 %v1013_v11, %v1012_v8  ;;  %v4631_v15 = vpop.f32.mrb[60].mxu0  ;;  %v5160_v8 = vld [vmem:[%s6069_s5 + $0x60] sm:$0xff]  }
 0x167   : > { %v950_v17 = vadd.f32 %v4631_v15, %v5468_v39  ;;  %v941_v18 = vpop.f32.mrb[61].mxu0 }
 0x168   : > { %v942_v19 = vadd.f32 %v5468_v39, %v941_v18  ;;  %v4632_v20 = vpop.f32.mrb[62].mxu0 }
 0x169   : > { %4718 = vmatmul.mubr.msk.bf16.vlgmr.msra.gmra.mrb[0].mxu1 %vm1073_vm1, %v5571_v14  ;;  %v1018_v21 = vmax.f32 %v950_v17, 0.0  ;;  %v953_v22 = vadd.f32 %v4632_v20, %v5468_v39  ;;  %v944_v23 = vpop.f32.mrb[63].mxu0  ;;  %v5164_v17 = vld [vmem:[%s6069_s5 + $0x80] sm:$0xff]  }
 0x16a   : > { %4722 = vmatpush3.bf16.msra.mxu1 %v5137_v1  ;;  %4725 = vmatprep.mubr.msk.bf16.mxu1 %vm1073_vm1, %v5583_v30  ;;  %v1016_v24 = vmax.f32 %v942_v19, 0.0  ;;  %v945_v25 = vadd.f32 %v5468_v39, %v944_v23  ;;  %v5141_v39 = vld [vmem:[%s6067_s3 + $0xd0] sm:$0xff]   ;;  %v5142_v30 = vld [vmem:[%s6067_s3 + $0xd8] sm:$0xff]  }
 0x16b   : > { %4723 = vmatprep.subr.bf16.mxu1 %v5138_v16  ;;  %v1019_v27 = vmax.f32 %v953_v22, 0.0  ;;  %v5155_v1 = vld [vmem:[%s6069_s5 + $0x50] sm:$0xff]   ;;  %v5165_v19 = vld [vmem:[%s6069_s5 + $0x98] sm:$0xff]  }
 0x16c   : > { %v1017_v28 = vmax.f32 %v945_v25, 0.0  ;;  %v5167_v22 = vld [vmem:[%s6069_s5 + $0xb0] sm:$0xff]   ;;  %v5169_v25 = vld [vmem:[%s6069_s5 + $0xb8] sm:$0xff]  }
 0x16d   : > { %v1051_v31 = vpack.c.bf16 %v1019_v27, %v1018_v21  ;;  %v5166_v21 = vld [vmem:[%s6069_s5 + $0x88] sm:$0xff]   ;;  %v5171_v27 = vld [vmem:[%s6069_s5 + $0xd0] sm:$0xff]  }
 0x16e   : > { %4724 = vmatpush3.bf16.msra.mxu1 %v5138_v16  ;;  %v1050_v14 = vpack.c.bf16 %v1017_v28, %v1016_v24  ;;  %v5168_v24 = vld [vmem:[%s6069_s5 + $0xa0] sm:$0xff]  }
 0x16f   : > { %4729 = vmatprep.subr.bf16.mxu1 %v5139_v26 }
 0x175   : > { %4726 = vmatmul.mubr.msk.bf16.vlgmr.msra.gmra.mrb[0].mxu1 %vm1073_vm1, %v5581_v29  ;;  %v5143_v29 = vld [vmem:[%s6067_s3 + $0xe0] sm:$0xff]  }
 0x176   : > { %4730 = vmatpush3.bf16.msra.mxu1 %v5139_v26  ;;  %4733 = vmatprep.mubr.msk.bf16.mxu1 %vm1073_vm1, %v5600_v47  ;;  %v5170_v26 = vld [vmem:[%s6069_s5 + $0xa8] sm:$0xff]  }
 0x177   : > { %4731 = vmatprep.subr.bf16.mxu1 %v5140_v32 }
 0x17a   : > { %4732 = vmatpush3.bf16.msra.mxu1 %v5140_v32  ;;  %v5173_v32 = vld [vmem:[%s6069_s5 + $0xd8] sm:$0xff]  }
 0x17b   : > { %4737 = vmatprep.subr.bf16.mxu1 %v5141_v39 }
 0x181   : > { %4734 = vmatmul.mubr.msk.bf16.vlgmr.msra.gmra.mrb[0].mxu1 %vm1073_vm1, %v5598_v46 }
 0x182   : > { %4738 = vmatpush3.bf16.msra.mxu1 %v5141_v39  ;;  %4741 = vmatprep.mubr.msk.bf16.mxu1 %vm1073_vm1, %v1046_v62  ;;  %v5153_v62 = vld [vmem:[%s6069_s5 + $0x38] sm:$0xff]   ;;  %v5174_v39 = vld [vmem:[%s6069_s5 + $0xc8] sm:$0xff]  }
 0x183   : > { %4739 = vmatprep.subr.bf16.mxu1 %v5142_v30 }
 0x186   : > { %4740 = vmatpush3.bf16.msra.mxu1 %v5142_v30  ;;  %v5175_v30 = vld [vmem:[%s6069_s5 + $0xf0] sm:$0xff]  }
 0x187   : > { %4745 = vmatprep.subr.bf16.mxu1 %v5143_v29 }
 0x18d   : > { %4742 = vmatmul.mubr.msk.bf16.vlgmr.msra.gmra.mrb[0].mxu1 %vm1073_vm1, %v1047_v61 }
 0x18e   : > { %4746 = vmatpush3.bf16.msra.mxu1 %v5143_v29  ;;  %4749 = vmatprep.mubr.msk.bf16.mxu1 %vm1073_vm1, %v1048_v13  ;;  %v5163_v13 = vld [vmem:[%s6069_s5 + $0x90] sm:$0xff]  }
 0x18f   : > { %4747 = vmatprep.subr.bf16.mxu1 %v5144_v33 }
 0x192   : > { %4748 = vmatpush3.bf16.msra.mxu1 %v5144_v33  ;;  %v5176_v33 = vld [vmem:[%s6069_s5 + $0xe0] sm:$0xff]  }
 0x193   : > { %4753 = vmatprep.subr.bf16.mxu1 %v5145_v34 }
 0x199   : > { %4750 = vmatmul.mubr.msk.bf16.vlgmr.msra.gmra.mrb[0].mxu1 %vm1073_vm1, %v1049_v12  ;;  %v5162_v12 = vld [vmem:[%s6069_s5 + $0x68] sm:$0xff]  }
 0x19a   : > { %4754 = vmatpush3.bf16.msra.mxu1 %v5145_v34  ;;  %4757 = vmatprep.mubr.msk.bf16.mxu1 %vm1073_vm1, %v1050_v14 }
 0x19b   : > { %4755 = vmatprep.subr.bf16.mxu1 %v5146_v35 }
 0x19e   : > { %4756 = vmatpush3.bf16.msra.mxu1 %v5146_v35  ;;  %v5177_v35 = vld [vmem:[%s6069_s5 + $0xf8] sm:$0xff]  }
 0x19f   : > { %4769 = vmatprep.subr.bf16.mxu1 %v5269_v42 }
 0x1a5   : > { %4758 = vmatmul.mubr.msk.bf16.vlgmr.msra.gmra.mrb[0].mxu1 %vm1073_vm1, %v1051_v31  ;;  %v5172_v31 = vld [vmem:[%s6069_s5 + $0xc0] sm:$0xff]  }
 0x1a6   : > { %4770 = vmatpush3.bf16.msra.mxu1 %v5147_v41  ;;  %4773 = vmatprep.mubr.msk.bf16.mxu1 %vm5270_vm2, %v5269_v42 }
 0x1a7   : > { %4771 = vmatprep.subr.bf16.mxu1 %v5269_v42 }
 0x1aa   : > { %4772 = vmatpush3.bf16.msra.mxu1 %v5149_v44 }
 0x1ab   : > { %4785 = vmatprep.subr.bf16.mxu1 %v5269_v42 }
 0x1e0   : > { %v4647_v36 = vpop.f32.mrb[64].mxu0 }
 0x1e1   : > { %v1181_v38 = vpop.f32.mrb[65].mxu0 }
 0x1e2   : > { %v4648_v37 = vpop.f32.mrb[66].mxu0 }
 0x1e3   : > { %v1184_v40 = vpop.f32.mrb[67].mxu0 }
 0x278   : > { %v4759_v46 = vpop.f32.mrb[0].mxu1 }
 0x279   : > { %v5688_v47 = vadd.f32 %v4759_v46, %v4647_v36  ;;  %v2241_v49 = vpop.f32.mrb[1].mxu1 }
 0x27a   : > { %v4982_v50 = vadd.f32 %v2241_v49, %v1181_v38  ;;  %v4760_v51 = vpop.f32.mrb[2].mxu1  ;;  %v5178_v38 = vld [vmem:[%s6069_s5 + $0xe8] sm:$0xff]  }
 0x27b   : > { %v4983_v52 = vadd.f32 %v4760_v51, %v4648_v37  ;;  %v2244_v53 = vpop.f32.mrb[3].mxu1  ;;  %v2269_v36 = vadd.f32 %v5688_v47, %v5693_v48  ;;  %v5179_v37 = vld [vmem:[%s6069_s5 + $0x110] sm:$0xff]   ;;  %v5182_v47 = vld [vmem:[%s6069_s5 + $0x108] sm:$0xff]   ;;  %v5185_v51 = vld [vmem:[%s6069_s5 + $0x138] sm:$0xff]  }
 0x27c   : > { %v2267_v54 = vadd.f32 %v4982_v50, %v5693_v48  ;;  %v4984_v55 = vadd.f32 %v2244_v53, %v1184_v40  ;;  %v5184_v50 = vld [vmem:[%s6069_s5 + $0x120] sm:$0xff]   ;;  %v5187_v53 = vld [vmem:[%s6069_s5 + $0x150] sm:$0xff]  }
 0x27d   : > { %v5697_v56 = vadd.f32 %v4983_v52, %v5693_v48  ;;  %v2273_v40 = vmax.f32 %v2269_v36, 0.0  ;;  %v5186_v52 = vld [vmem:[%s6069_s5 + $0x128] sm:$0xff]  }
 0x27e   : > { %v2271_v57 = vmax.f32 %v2267_v54, 0.0  ;;  %v2268_v11 = vadd.f32 %v4984_v55, %v5693_v48  ;;  %v5183_v48 = vld [vmem:[%s6069_s5 + $0x130] sm:$0xff]   ;;  %v5188_v55 = vld [vmem:[%s6069_s5 + $0x140] sm:$0xff]  }
 0x27f   : > { %v5882_v46 = vpack.c.bf16 %v2273_v40, %v2273_v40 }
 0x280   : > { %v5702_v59 = vpack.c.bf16 %v2271_v57, %v2271_v57  ;;  %v2272_v15 = vmax.f32 %v2268_v11, 0.0  ;;  %v5201_v11 = vld [vmem:[%s6071_s7 + $0x20] sm:$0xff]  }
 0x281   : > { %v3335_v49 = vshrl.u32 %v5882_v46, 16  ;;  %v3399_v57 = vrot.slane %v5882_v46, 1 }
 0x282   : > { %4774 = vmatmul.mubr.msk.bf16.vlgmr.msra.gmra.mrb[4].mxu1 %vm1073_vm1, %v5702_v59  ;;  %v2286_v61 = vshrl.u32 %v5702_v59, 16  ;;  %v2403_v4 = vrot.slane %v5702_v59, 1  ;;  %v2527_v9 = vrot.slane %v5702_v59, 2  ;;  %v2651_v18 = vrot.slane %v5702_v59, 3  ;;  %v5190_v59 = vld [vmem:[%s6069_s5 + $0x148] sm:$0xff]  }
 0x283   : > { %4786 = vmatpush3.bf16.msra.mxu1 %v5151_v58  ;;  %4789 = vmatprep.mubr.msk.bf16.mxu1 %vm5270_vm2, %v5269_v42  ;;  %v5785_v20 = vpack.c.bf16 %v2272_v15, %v2272_v15  ;;  %v3461_v54 = vrot.slane %v3335_v49, 1  ;;  %v5189_v58 = vld [vmem:[%s6069_s5 + $0x158] sm:$0xff]  }
 0x284   : > { %4766 = vmatmul.mubr.msk.bf16.vlgmr.msra.gmra.mrb[68].mxu0 %vm1073_vm1, %v2286_v61  ;;  %4787 = vmatprep.subr.bf16.mxu1 %v5269_v42  ;;  %v2465_v2 = vrot.slane %v2286_v61, 1  ;;  %v2589_v7 = vrot.slane %v2286_v61, 2  ;;  %v2713_v16 = vrot.slane %v2286_v61, 3  ;;  %v3585_v61 = vrot.slane %v3335_v49, 2  ;;  %v5204_v15 = vld [vmem:[%s6071_s7 + $0x38] sm:$0xff]  }
 0x285   : > { %4778 = vmatpush3.bf16.msra.mxu0 %v5152_v60  ;;  %4781 = vmatprep.mubr.msk.bf16.mxu0 %vm5270_vm2, %v5269_v42  ;;  %v2837_v23 = vshrl.u32 %v5785_v20, 16  ;;  %v2901_v14 = vrot.slane %v5785_v20, 1  ;;  %v3025_v34 = vrot.slane %v5785_v20, 2  ;;  %v3149_v44 = vrot.slane %v5785_v20, 3  ;;  %v5191_v60 = vld [vmem:[%s6069_s5 + $0x170] sm:$0xff]  }
 0x286   : > { %4779 = vmatprep.subr.bf16.mxu0 %v5269_v42 }
 0x287   : > { %4788 = vmatpush3.bf16.msra.mxu1 %v5153_v62  ;;  %v2963_v28 = vrot.slane %v2837_v23, 1  ;;  %v3087_v29 = vrot.slane %v2837_v23, 2  ;;  %v3211_v41 = vrot.slane %v2837_v23, 3  ;;  %v5192_v62 = vld [vmem:[%s6069_s5 + $0x160] sm:$0xff]  }
 0x288   : > { %4801 = vmatprep.subr.bf16.mxu1 %v5269_v42 }
 0x289   : > { %4780 = vmatpush3.bf16.msra.mxu0 %v5154_v0  ;;  %v3523_v0 = vrot.slane %v5882_v46, 2 }
 0x28a   : > { %4790 = vmatmul.mubr.msk.bf16.vlgmr.msra.gmra.mrb[8].mxu1 %vm1073_vm1, %v2465_v2  ;;  %4793 = vmatprep.subr.bf16.mxu0 %v5269_v42  ;;  %v5194_v2 = vld [vmem:[%s6069_s5 + $0x168] sm:$0xff]  }
 0x28b   : > { %4802 = vmatpush3.bf16.msra.mxu1 %v5155_v1  ;;  %4805 = vmatprep.mubr.msk.bf16.mxu1 %vm5270_vm2, %v5269_v42  ;;  %v5193_v1 = vld [vmem:[%s6069_s5 + $0x178] sm:$0xff]  }
 0x28c   : > { %4782 = vmatmul.mubr.msk.bf16.vlgmr.msra.gmra.mrb[72].mxu0 %vm1073_vm1, %v2403_v4  ;;  %4803 = vmatprep.subr.bf16.mxu1 %v5269_v42  ;;  %v5195_v4 = vld [vmem:[%s6069_s5 + $0x180] sm:$0xff]  }
 0x28d   : > { %4794 = vmatpush3.bf16.msra.mxu0 %v5156_v3  ;;  %4797 = vmatprep.mubr.msk.bf16.mxu0 %vm5270_vm2, %v5269_v42  ;;  %v3709_v3 = vrot.slane %v3335_v49, 3 }
 0x28e   : > { %4795 = vmatprep.subr.bf16.mxu0 %v5269_v42 }
 0x28f   : > { %4804 = vmatpush3.bf16.msra.mxu1 %v5157_v5  ;;  %v3647_v5 = vrot.slane %v5882_v46, 3 }
 0x290   : > { %4817 = vmatprep.subr.bf16.mxu1 %v5269_v42 }
 0x291   : > { %4796 = vmatpush3.bf16.msra.mxu0 %v5158_v6  ;;  %v5196_v6 = vld [vmem:[%s6069_s5 + $0x188] sm:$0xff]  }
 0x292   : > { %4806 = vmatmul.mubr.msk.bf16.vlgmr.msra.gmra.mrb[12].mxu1 %vm1073_vm1, %v2589_v7  ;;  %4809 = vmatprep.subr.bf16.mxu0 %v5269_v42 }
 0x293   : > { %4818 = vmatpush3.bf16.msra.mxu1 %v5159_v63  ;;  %4821 = vmatprep.mubr.msk.bf16.mxu1 %vm5270_vm2, %v5269_v42  ;;  %v2274_v63 = vmax.f32 %v5697_v56, 0.0  ;;  %v5199_v56 = vld [vmem:[%s6071_s7 + $0x10] sm:$0xff]  }
 0x294   : > { %4798 = vmatmul.mubr.msk.bf16.vlgmr.msra.gmra.mrb[76].mxu0 %vm1073_vm1, %v2527_v9  ;;  %4819 = vmatprep.subr.bf16.mxu1 %v5269_v42  ;;  %v5198_v9 = vld [vmem:[%s6071_s7 + $0x8] sm:$0xff]  }
 0x295   : > { %4810 = vmatpush3.bf16.msra.mxu0 %v5160_v8  ;;  %4813 = vmatprep.mubr.msk.bf16.mxu0 %vm5270_vm2, %v5269_v42  ;;  %v3766_v7 = vpack.c.bf16 %v2274_v63, %v2274_v63  ;;  %v5197_v8 = vld [vmem:[%s6071_s7] sm:$0xff]  }
 0x296   : > { %4811 = vmatprep.subr.bf16.mxu0 %v5269_v42 }
 0x297   : > { %4820 = vmatpush3.bf16.msra.mxu1 %v5161_v10  ;;  %v5200_v10 = vld [vmem:[%s6071_s7 + $0x18] sm:$0xff]  }
 0x298   : > { %4833 = vmatprep.subr.bf16.mxu1 %v5269_v42 }
 0x299   : > { %4812 = vmatpush3.bf16.msra.mxu0 %v5162_v12  ;;  %v5202_v12 = vld [vmem:[%s6071_s7 + $0x28] sm:$0xff]  }
 0x29a   : > { %4822 = vmatmul.mubr.msk.bf16.vlgmr.msra.gmra.mrb[16].mxu1 %vm1073_vm1, %v2713_v16  ;;  %4825 = vmatprep.subr.bf16.mxu0 %v5269_v42 }
 0x29b   : > { %4834 = vmatpush3.bf16.msra.mxu1 %v5163_v13  ;;  %4837 = vmatprep.mubr.msk.bf16.mxu1 %vm5270_vm2, %v5269_v42  ;;  %v5203_v13 = vld [vmem:[%s6071_s7 + $0x30] sm:$0xff]  }
 0x29c   : > { %4814 = vmatmul.mubr.msk.bf16.vlgmr.msra.gmra.mrb[80].mxu0 %vm1073_vm1, %v2651_v18  ;;  %4835 = vmatprep.subr.bf16.mxu1 %v5269_v42 }
 0x29d   : > { %4826 = vmatpush3.bf16.msra.mxu0 %v5164_v17  ;;  %4829 = vmatprep.mubr.msk.bf16.mxu0 %vm5270_vm2, %v5269_v42 }
 0x29e   : > { %4827 = vmatprep.subr.bf16.mxu0 %v5269_v42 }
 0x29f   : > { %4836 = vmatpush3.bf16.msra.mxu1 %v5165_v19 }
 0x2a0   : > { %4849 = vmatprep.subr.bf16.mxu1 %v5269_v42 }
 0x2a1   : > { %4828 = vmatpush3.bf16.msra.mxu0 %v5166_v21 }
 0x2a2   : > { %4838 = vmatmul.mubr.msk.bf16.vlgmr.msra.gmra.mrb[20].mxu1 %vm1073_vm1, %v2837_v23  ;;  %4841 = vmatprep.subr.bf16.mxu0 %v5269_v42 }
 0x2a3   : > { %4850 = vmatpush3.bf16.msra.mxu1 %v5167_v22  ;;  %4853 = vmatprep.mubr.msk.bf16.mxu1 %vm5270_vm2, %v5269_v42 }
 0x2a4   : > { %4830 = vmatmul.mubr.msk.bf16.vlgmr.msra.gmra.mrb[84].mxu0 %vm1073_vm1, %v5785_v20  ;;  %4851 = vmatprep.subr.bf16.mxu1 %v5269_v42 }
 0x2a5   : > { %4842 = vmatpush3.bf16.msra.mxu0 %v5168_v24  ;;  %4845 = vmatprep.mubr.msk.bf16.mxu0 %vm5270_vm2, %v5269_v42 }
 0x2a6   : > { %4843 = vmatprep.subr.bf16.mxu0 %v5269_v42 }
 0x2a7   : > { %4852 = vmatpush3.bf16.msra.mxu1 %v5169_v25 }
 0x2a8   : > { %4865 = vmatprep.subr.bf16.mxu1 %v5269_v42 }
 0x2a9   : > { %4844 = vmatpush3.bf16.msra.mxu0 %v5170_v26 }
 0x2aa   : > { %4854 = vmatmul.mubr.msk.bf16.vlgmr.msra.gmra.mrb[24].mxu1 %vm1073_vm1, %v2963_v28  ;;  %4857 = vmatprep.subr.bf16.mxu0 %v5269_v42 }
 0x2ab   : > { %4866 = vmatpush3.bf16.msra.mxu1 %v5171_v27  ;;  %4869 = vmatprep.mubr.msk.bf16.mxu1 %vm5270_vm2, %v5269_v42 }
 0x2ac   : > { %4846 = vmatmul.mubr.msk.bf16.vlgmr.msra.gmra.mrb[88].mxu0 %vm1073_vm1, %v2901_v14  ;;  %4867 = vmatprep.subr.bf16.mxu1 %v5269_v42 }
 0x2ad   : > { %4858 = vmatpush3.bf16.msra.mxu0 %v5172_v31  ;;  %4861 = vmatprep.mubr.msk.bf16.mxu0 %vm5270_vm2, %v5269_v42 }
 0x2ae   : > { %4859 = vmatprep.subr.bf16.mxu0 %v5269_v42 }
 0x2af   : > { %4868 = vmatpush3.bf16.msra.mxu1 %v5173_v32 }
 0x2b0   : > { %4881 = vmatprep.subr.bf16.mxu1 %v5269_v42 }
 0x2b1   : > { %4860 = vmatpush3.bf16.msra.mxu0 %v5174_v39 }
 0x2b2   : > { %4870 = vmatmul.mubr.msk.bf16.vlgmr.msra.gmra.mrb[28].mxu1 %vm1073_vm1, %v3087_v29  ;;  %4873 = vmatprep.subr.bf16.mxu0 %v5269_v42 }
 0x2b3   : > { %4882 = vmatpush3.bf16.msra.mxu1 %v5175_v30  ;;  %4885 = vmatprep.mubr.msk.bf16.mxu1 %vm5270_vm2, %v5269_v42 }
 0x2b4   : > { %4862 = vmatmul.mubr.msk.bf16.vlgmr.msra.gmra.mrb[92].mxu0 %vm1073_vm1, %v3025_v34  ;;  %4883 = vmatprep.subr.bf16.mxu1 %v5269_v42 }
 0x2b5   : > { %4874 = vmatpush3.bf16.msra.mxu0 %v5176_v33  ;;  %4877 = vmatprep.mubr.msk.bf16.mxu0 %vm5270_vm2, %v5269_v42 }
 0x2b6   : > { %4875 = vmatprep.subr.bf16.mxu0 %v5269_v42 }
 0x2b7   : > { %4884 = vmatpush3.bf16.msra.mxu1 %v5177_v35 }
 0x2b8   : > { %4897 = vmatprep.subr.bf16.mxu1 %v5269_v42 }
 0x2b9   : > { %4876 = vmatpush3.bf16.msra.mxu0 %v5178_v38 }
 0x2ba   : > { %4886 = vmatmul.mubr.msk.bf16.vlgmr.msra.gmra.mrb[32].mxu1 %vm1073_vm1, %v3211_v41  ;;  %4889 = vmatprep.subr.bf16.mxu0 %v5269_v42 }
 0x2bb   : > { %4898 = vmatpush3.bf16.msra.mxu1 %v5179_v37  ;;  %4901 = vmatprep.mubr.msk.bf16.mxu1 %vm5270_vm2, %v5269_v42 }
 0x2bc   : > { %4878 = vmatmul.mubr.msk.bf16.vlgmr.msra.gmra.mrb[96].mxu0 %vm1073_vm1, %v3149_v44  ;;  %4899 = vmatprep.subr.bf16.mxu1 %v5269_v42 }
 0x2bd   : > { %4890 = vmatpush3.bf16.msra.mxu0 %v5180_v43  ;;  %4893 = vmatprep.mubr.msk.bf16.mxu0 %vm5270_vm2, %v5269_v42 }
 0x2be   : > { %4891 = vmatprep.subr.bf16.mxu0 %v5269_v42 }
 0x2bf   : > { %4900 = vmatpush3.bf16.msra.mxu1 %v5181_v45 }
 0x2c0   : > { %4913 = vmatprep.subr.bf16.mxu1 %v5269_v42 }
 0x2c1   : > { %4892 = vmatpush3.bf16.msra.mxu0 %v5182_v47 }
 0x2c2   : > { %4902 = vmatmul.mubr.msk.bf16.vlgmr.msra.gmra.mrb[36].mxu1 %vm1073_vm1, %v3335_v49  ;;  %4905 = vmatprep.subr.bf16.mxu0 %v5269_v42 }
 0x2c3   : > { %4914 = vmatpush3.bf16.msra.mxu1 %v5183_v48  ;;  %4917 = vmatprep.mubr.msk.bf16.mxu1 %vm5270_vm2, %v5269_v42 }
 0x2c4   : > { %4894 = vmatmul.mubr.msk.bf16.vlgmr.msra.gmra.mrb[100].mxu0 %vm1073_vm1, %v5882_v46  ;;  %4915 = vmatprep.subr.bf16.mxu1 %v5269_v42 }
 0x2c5   : > { %4906 = vmatpush3.bf16.msra.mxu0 %v5184_v50  ;;  %4909 = vmatprep.mubr.msk.bf16.mxu0 %vm5270_vm2, %v5269_v42 }
 0x2c6   : > { %4907 = vmatprep.subr.bf16.mxu0 %v5269_v42 }
 0x2c7   : > { %4916 = vmatpush3.bf16.msra.mxu1 %v5185_v51 }
 0x2c8   : > { %4929 = vmatprep.subr.bf16.mxu1 %v5269_v42 }
 0x2c9   : > { %4908 = vmatpush3.bf16.msra.mxu0 %v5186_v52 }
 0x2ca   : > { %4918 = vmatmul.mubr.msk.bf16.vlgmr.msra.gmra.mrb[40].mxu1 %vm1073_vm1, %v3461_v54  ;;  %4921 = vmatprep.subr.bf16.mxu0 %v5269_v42 }
 0x2cb   : > { %4930 = vmatpush3.bf16.msra.mxu1 %v5187_v53  ;;  %4933 = vmatprep.mubr.msk.bf16.mxu1 %vm5270_vm2, %v5269_v42 }
 0x2cc   : > { %4910 = vmatmul.mubr.msk.bf16.vlgmr.msra.gmra.mrb[104].mxu0 %vm1073_vm1, %v3399_v57  ;;  %4931 = vmatprep.subr.bf16.mxu1 %v5269_v42 }
 0x2cd   : > { %4922 = vmatpush3.bf16.msra.mxu0 %v5188_v55  ;;  %4925 = vmatprep.mubr.msk.bf16.mxu0 %vm5270_vm2, %v5269_v42 }
 0x2ce   : > { %4923 = vmatprep.subr.bf16.mxu0 %v5269_v42 }
 0x2cf   : > { %4932 = vmatpush3.bf16.msra.mxu1 %v5189_v58 }
 0x2d0   : > { %4945 = vmatprep.subr.bf16.mxu1 %v5269_v42 }
 0x2d1   : > { %4924 = vmatpush3.bf16.msra.mxu0 %v5190_v59 }
 0x2d2   : > { %4934 = vmatmul.mubr.msk.bf16.vlgmr.msra.gmra.mrb[44].mxu1 %vm1073_vm1, %v3585_v61  ;;  %4937 = vmatprep.subr.bf16.mxu0 %v5269_v42 }
 0x2d3   : > { %4946 = vmatpush3.bf16.msra.mxu1 %v5191_v60  ;;  %4949 = vmatprep.mubr.msk.bf16.mxu1 %vm5270_vm2, %v5269_v42 }
 0x2d4   : > { %4926 = vmatmul.mubr.msk.bf16.vlgmr.msra.gmra.mrb[108].mxu0 %vm1073_vm1, %v3523_v0  ;;  %4947 = vmatprep.subr.bf16.mxu1 %v5269_v42 }
 0x2d5   : > { %4938 = vmatpush3.bf16.msra.mxu0 %v5192_v62  ;;  %4941 = vmatprep.mubr.msk.bf16.mxu0 %vm5270_vm2, %v5269_v42 }
 0x2d6   : > { %4939 = vmatprep.subr.bf16.mxu0 %v5269_v42 }
 0x2d7   : > { %4948 = vmatpush3.bf16.msra.mxu1 %v5193_v1 }
 0x2d8   : > { %4961 = vmatprep.subr.bf16.mxu1 %v5269_v42 }
 0x2d9   : > { %4940 = vmatpush3.bf16.msra.mxu0 %v5194_v2 }
 0x2da   : > { %4950 = vmatmul.mubr.msk.bf16.vlgmr.msra.gmra.mrb[48].mxu1 %vm1073_vm1, %v3709_v3  ;;  %4953 = vmatprep.subr.bf16.mxu0 %v5269_v42 }
 0x2db   : > { %4977 = vmatprep.mubr.msk.bf16.mxu1 %vm5270_vm2, %v5269_v42  ;;  %4962 = vmatpush3.bf16.msra.mxu1 %v5197_v8 }
 0x2dc   : > { %4942 = vmatmul.mubr.msk.bf16.vlgmr.msra.gmra.mrb[112].mxu0 %vm1073_vm1, %v3647_v5  ;;  %4963 = vmatprep.subr.bf16.mxu1 %v5269_v42 }
 0x2dd   : > { %4954 = vmatpush3.bf16.msra.mxu0 %v5195_v4  ;;  %4957 = vmatprep.mubr.msk.bf16.mxu0 %vm5270_vm2, %v5269_v42 }
 0x2de   : > { %4955 = vmatprep.subr.bf16.mxu0 %v5269_v42 }
 0x2df   : > { %4964 = vmatpush3.bf16.msra.mxu1 %v5198_v9 }
 0x2e0   : > { %4965 = vmatprep.subr.bf16.mxu1 %v5269_v42 }
 0x2e1   : > { %4956 = vmatpush3.bf16.msra.mxu0 %v5196_v6 }
 0x2e3   : > { %4966 = vmatpush3.bf16.msra.mxu1 %v5199_v56 }
 0x2e4   : > { %4958 = vmatmul.mubr.msk.bf16.vlgmr.msra.gmra.mrb[116].mxu0 %vm1073_vm1, %v3766_v7  ;;  %4967 = vmatprep.subr.bf16.mxu1 %v5269_v42 }
 0x2e7   : > { %4968 = vmatpush3.bf16.msra.mxu1 %v5200_v10 }
 0x2e8   : > { %4969 = vmatprep.subr.bf16.mxu1 %v5269_v42 }
 0x2eb   : > { %4970 = vmatpush3.bf16.msra.mxu1 %v5201_v11 }
 0x2ec   : > { %4971 = vmatprep.subr.bf16.mxu1 %v5269_v42 }
 0x2ef   : > { %4972 = vmatpush3.bf16.msra.mxu1 %v5202_v12 }
 0x2f0   : > { %4973 = vmatprep.subr.bf16.mxu1 %v5269_v42 }
 0x2f3   : > { %4974 = vmatpush3.bf16.msra.mxu1 %v5203_v13 }
 0x2f4   : > { %4975 = vmatprep.subr.bf16.mxu1 %v5269_v42 }
 0x2f7   : > { %4976 = vmatpush3.bf16.msra.mxu1 %v5204_v15 }
 0x355   : > { %v2391_v16 = vpop.f32.mrb[4].mxu1 }
 0x356   : > { %v4775_v17 = vpop.f32.mrb[5].mxu1 }
 0x357   : > { %v2337_v18 = vpop.f32.mrb[68].mxu0  ;;  %v2394_v19 = vpop.f32.mrb[6].mxu1 }
 0x358   : > { %v2392_v20 = vadd.f32 %v2391_v16, %v2337_v18  ;;  %v4767_v21 = vpop.f32.mrb[69].mxu0  ;;  %v4776_v22 = vpop.f32.mrb[7].mxu1 }
 0x359   : > { %v2340_v23 = vpop.f32.mrb[70].mxu0 }
 0x35a   : > { %v4768_v24 = vpop.f32.mrb[71].mxu0 }
 0x35d   : > { %v2515_v25 = vpop.f32.mrb[8].mxu1 }
 0x35e   : > { %v4791_v26 = vpop.f32.mrb[9].mxu1 }
 0x35f   : > { %v2453_v27 = vpop.f32.mrb[72].mxu0  ;;  %v2518_v28 = vpop.f32.mrb[10].mxu1 }
 0x360   : > { %v2459_v31 = vadd.f32 %v2453_v27, %v2392_v20  ;;  %v4783_v42 = vpop.f32.mrb[73].mxu0  ;;  %v4792_v14 = vpop.f32.mrb[11].mxu1 }
 0x361   : > { %v2456_v32 = vpop.f32.mrb[74].mxu0 }
 0x362   : > { %v4784_v39 = vpop.f32.mrb[75].mxu0  ;;  %v2521_v30 = vadd.f32 %v2515_v25, %v2459_v31 }
 0x365   : > { %v2639_v29 = vpop.f32.mrb[12].mxu1 }
 0x366   : > { %v4807_v33 = vpop.f32.mrb[13].mxu1 }
 0x367   : > { %v2577_v34 = vpop.f32.mrb[76].mxu0  ;;  %v2642_v35 = vpop.f32.mrb[14].mxu1 }
 0x368   : > { %v2583_v36 = vadd.f32 %v2577_v34, %v2521_v30  ;;  %v4799_v38 = vpop.f32.mrb[77].mxu0  ;;  %v4808_v37 = vpop.f32.mrb[15].mxu1 }
 0x369   : > { %v2580_v40 = vpop.f32.mrb[78].mxu0 }
 0x36a   : > { %v4800_v41 = vpop.f32.mrb[79].mxu0  ;;  %v2645_v43 = vadd.f32 %v2639_v29, %v2583_v36 }
 0x36d   : > { %v2763_v44 = vpop.f32.mrb[16].mxu1 }
 0x36e   : > { %v4823_v45 = vpop.f32.mrb[17].mxu1 }
 0x36f   : > { %v2701_v46 = vpop.f32.mrb[80].mxu0  ;;  %v2766_v47 = vpop.f32.mrb[18].mxu1 }
 0x370   : > { %v2707_v48 = vadd.f32 %v2701_v46, %v2645_v43  ;;  %v4815_v49 = vpop.f32.mrb[81].mxu0  ;;  %v4824_v50 = vpop.f32.mrb[19].mxu1 }
 0x371   : > { %v2704_v51 = vpop.f32.mrb[82].mxu0 }
 0x372   : > { %v4816_v52 = vpop.f32.mrb[83].mxu0  ;;  %v2769_v53 = vadd.f32 %v2763_v44, %v2707_v48 }
 0x375   : > { %v2888_v54 = vpop.f32.mrb[20].mxu1 }
 0x376   : > { %v4839_v55 = vpop.f32.mrb[21].mxu1 }
 0x377   : > { %v2825_v57 = vpop.f32.mrb[84].mxu0  ;;  %v2891_v58 = vpop.f32.mrb[22].mxu1 }
 0x378   : > { %v2831_v59 = vadd.f32 %v2825_v57, %v2769_v53  ;;  %v4831_v60 = vpop.f32.mrb[85].mxu0  ;;  %v4840_v61 = vpop.f32.mrb[23].mxu1 }
 0x379   : > { %v2828_v62 = vpop.f32.mrb[86].mxu0 }
 0x37a   : > { %v4832_v0 = vpop.f32.mrb[87].mxu0  ;;  %v2894_v1 = vadd.f32 %v2888_v54, %v2831_v59 }
 0x37d   : > { %v3013_v2 = vpop.f32.mrb[24].mxu1 }
 0x37e   : > { %v4855_v3 = vpop.f32.mrb[25].mxu1 }
 0x37f   : > { %v2951_v4 = vpop.f32.mrb[88].mxu0  ;;  %v3016_v5 = vpop.f32.mrb[26].mxu1 }
 0x380   : > { %v2957_v6 = vadd.f32 %v2951_v4, %v2894_v1  ;;  %v4847_v63 = vpop.f32.mrb[89].mxu0  ;;  %v4856_v7 = vpop.f32.mrb[27].mxu1 }
 0x381   : > { %v2954_v8 = vpop.f32.mrb[90].mxu0 }
 0x382   : > { %v4848_v9 = vpop.f32.mrb[91].mxu0  ;;  %v3019_v56 = vadd.f32 %v3013_v2, %v2957_v6  ;;  %v3828_v8 = vld [vmem:[%s6070_s6] sm:$0x1] }
 0x385   : > { %v3137_v10 = vpop.f32.mrb[28].mxu1 }
 0x386   : > { %v4871_v11 = vpop.f32.mrb[29].mxu1 }
 0x387   : > { %v3075_v12 = vpop.f32.mrb[92].mxu0  ;;  %v3140_v13 = vpop.f32.mrb[30].mxu1 }
 0x388   : > { %v3081_v15 = vadd.f32 %v3075_v12, %v3019_v56  ;;  %v4863_v16 = vpop.f32.mrb[93].mxu0  ;;  %v4872_v17 = vpop.f32.mrb[31].mxu1 }
 0x389   : > { %v3078_v18 = vpop.f32.mrb[94].mxu0  ;;  %v3848_v16 = vld [vmem:[%s6072_s8] sm:$0x1] }
 0x38a   : > { %v4864_v19 = vpop.f32.mrb[95].mxu0  ;;  %v3143_v20 = vadd.f32 %v3137_v10, %v3081_v15 }
 0x38d   : > { %v3261_v21 = vpop.f32.mrb[32].mxu1 }
 0x38e   : > { %v4887_v22 = vpop.f32.mrb[33].mxu1 }
 0x38f   : > { %v3199_v23 = vpop.f32.mrb[96].mxu0  ;;  %v3264_v24 = vpop.f32.mrb[34].mxu1 }
 0x390   : > { %v3205_v25 = vadd.f32 %v3199_v23, %v3143_v20  ;;  %v4879_v26 = vpop.f32.mrb[97].mxu0  ;;  %v4888_v27 = vpop.f32.mrb[35].mxu1 }
 0x391   : > { %v3202_v28 = vpop.f32.mrb[98].mxu0 }
 0x392   : > { %v4880_v31 = vpop.f32.mrb[99].mxu0  ;;  %v3267_v42 = vadd.f32 %v3261_v21, %v3205_v25 }
 0x395   : > { %v3386_v14 = vpop.f32.mrb[36].mxu1 }
 0x396   : > { %v4903_v32 = vpop.f32.mrb[37].mxu1 }
 0x397   : > { %v3323_v39 = vpop.f32.mrb[100].mxu0  ;;  %v3389_v30 = vpop.f32.mrb[38].mxu1 }
 0x398   : > { %v3329_v29 = vadd.f32 %v3323_v39, %v3267_v42  ;;  %v4895_v33 = vpop.f32.mrb[101].mxu0  ;;  %v4904_v34 = vpop.f32.mrb[39].mxu1 }
 0x399   : > { %v3326_v35 = vpop.f32.mrb[102].mxu0 }
 0x39a   : > { %v4896_v36 = vpop.f32.mrb[103].mxu0  ;;  %v3392_v38 = vadd.f32 %v3386_v14, %v3329_v29 }
 0x39d   : > { %v3511_v37 = vpop.f32.mrb[40].mxu1 }
 0x39e   : > { %v4919_v40 = vpop.f32.mrb[41].mxu1 }
 0x39f   : > { %v3449_v41 = vpop.f32.mrb[104].mxu0  ;;  %v3514_v43 = vpop.f32.mrb[42].mxu1 }
 0x3a0   : > { %v3455_v44 = vadd.f32 %v3449_v41, %v3392_v38  ;;  %v4911_v45 = vpop.f32.mrb[105].mxu0  ;;  %v4920_v46 = vpop.f32.mrb[43].mxu1 }
 0x3a1   : > { %v3452_v47 = vpop.f32.mrb[106].mxu0 }
 0x3a2   : > { %v4912_v48 = vpop.f32.mrb[107].mxu0  ;;  %v3517_v49 = vadd.f32 %v3511_v37, %v3455_v44 }
 0x3a5   : > { %v3635_v50 = vpop.f32.mrb[44].mxu1 }
 0x3a6   : > { %v4935_v51 = vpop.f32.mrb[45].mxu1 }
 0x3a7   : > { %v3573_v52 = vpop.f32.mrb[108].mxu0  ;;  %v3638_v53 = vpop.f32.mrb[46].mxu1 }
 0x3a8   : > { %v3579_v54 = vadd.f32 %v3573_v52, %v3517_v49  ;;  %v4927_v55 = vpop.f32.mrb[109].mxu0  ;;  %v4936_v57 = vpop.f32.mrb[47].mxu1 }
 0x3a9   : > { %v3576_v58 = vpop.f32.mrb[110].mxu0 }
 0x3aa   : > { %v4928_v59 = vpop.f32.mrb[111].mxu0  ;;  %v3641_v60 = vadd.f32 %v3635_v50, %v3579_v54 }
 0x3ad   : > { %v3759_v61 = vpop.f32.mrb[48].mxu1 }
 0x3ae   : > { %v4951_v62 = vpop.f32.mrb[49].mxu1 }
 0x3af   : > { %v3697_v0 = vpop.f32.mrb[112].mxu0  ;;  %v3762_v1 = vpop.f32.mrb[50].mxu1 }
 0x3b0   : > { %v3703_v2 = vadd.f32 %v3697_v0, %v3641_v60  ;;  %v4943_v3 = vpop.f32.mrb[113].mxu0  ;;  %v4952_v4 = vpop.f32.mrb[51].mxu1 }
 0x3b1   : > { %v3700_v5 = vpop.f32.mrb[114].mxu0 }
 0x3b2   : > { %v4944_v6 = vpop.f32.mrb[115].mxu0  ;;  %v3765_v63 = vadd.f32 %v3759_v61, %v3703_v2 }
 0x3b7   : > { %v3821_v7 = vpop.f32.mrb[116].mxu0 }
 0x3b8   : > { %v3827_v9 = vadd.f32 %v3821_v7, %v3765_v63  ;;  %v4959_v56 = vpop.f32.mrb[117].mxu0 }
 0x3b9   : > { %v3824_v10 = vpop.f32.mrb[118].mxu0 }
 0x3ba   : > { %v3829_v11 = vadd.f32 %v3828_v8, %v3827_v9  ;;  %v4960_v12 = vpop.f32.mrb[119].mxu0 }
 0x3bc   : > { %v3830_v13 = vmax.f32 %v3829_v11, 0.0 }
 0x3be   : > { %v3831_v15 = vpack.c.bf16 %v3830_v13, %v3830_v13 }
 0x3c0   : > { %4978 = vmatmul.mubr.bf16.vlgmr.msra.gmra.mrb[52].mxu1 %v3831_v15 }
 0x493   : > { %v3931_v17 = vpop.f32.mrb[52].mxu1 }
 0x494   : > { %v3932_v18 = vadd.f32 %v3931_v17, %v3848_v16  ;;  %v4979_v19 = vpop.f32.mrb[53].mxu1 }
 0x495   : > { %v3934_v20 = vpop.f32.mrb[54].mxu1 }
 0x496   : > { %3937 = vst [vmem:[%s324_s26] sm:$0x1] %v3932_v18  ;;  %v4980_v21 = vpop.f32.mrb[55].mxu1 }
 0x497   : > { %5218 = shalt.err (!%p5215_p3)
}
 0x498   : > { %s5219_s22 = scalar_lea.hbm %s6022_s27, 16  ;;  %s5223_s26 = scalar_lea.hbm %s6073_s9, 32 }
 0x499   : > { %p5220_p4 = scmp.ne.s32.totalorder %s6022_s27, %s5219_s22  ;;  %p5224_p9 = scmp.lt.u32.totalorder %s6022_s27, %s6073_s9 }
 0x49a   : > { %p5225_p10 = scmp.lt.u32.totalorder %s5223_s26, %s5219_s22  ;;  %p5227_p12 = scmp.lt.u32.totalorder %s5219_s22, %s6022_s27 }
 0x49b   : > { %p5221_p7 = pnand %p5220_p4, %p5360_p5 }
 0x49c   : > { %p5226_p11 = por %p5225_p10, %p5224_p9 }
 0x49d   : > { %p5222_p8 = pneg %p5221_p7 }
 0x49e   : > { %p5228_p13 = por %p5227_p12, %p5226_p11 }
 0x4a0   : > { %p5229_p0 = pnand %p5228_p13, %p5222_p8 }
 0x4a2   : > { %5232 = shalt.err (!%p5229_p0)
}
 0x4a3   : > { %5041 = dma.vmem_to_hbm [thread:$0]  (%p5360_p5), %s6024_s28, 16, %s6022_s27, %s3939_s16  }
 0x4a4 PF: > { %p5047_p1 = scmp.ge.s32.totalorder %s5267_s12, 2  ;;  %s3963_s13 = sand.u32 1, %s5255_s30  }
 0x4a5   : > { %s3964_s17 = scalar_lea.sflag [#allocation3], %s3963_s13 }
 0x4a6   : > { %p5044_p2 = pnand %p5047_p1, %p5364_p6 }
 0x4a8   : > { %5250 = dma.done.wait (!%p5044_p2), %s3964_s17, 16  }
 0x4a9   : > { %5252 = vsyncadd (!%p5044_p2), %s3964_s17, 4294967280  ;;  %p19_p3 = scmp.ge.s32.totalorder %s5347_s15, 4   ;;  %s6076_s30 = smov %s5259_s10 }
 0x4aa   : > { %s6077_s10 = smov %s5263_s11  ;;  %s6078_s11 = smov %s5358_s18 }
 0x4ab   : > { %s6079_s12 = smov %s5347_s15  ;;  %21 = sbr.rel (!%p19_p3) target bundleno = 3 (0x3), region = 130 }
 0x4b2   :  { %3968 = vsyncpa [#allocation3], 1 }
 0x4b3   :  { %3970 = vsyncpa [#allocation3 + $0x1], 1 }

</bundles_post_ra>
